<compile_context>
chip_gen: v5e
topology: v5e:2x2
jax: 0.10.0
libtpu: 0.0.40
codegen_flags: <defaults>
</compile_context>

<pallas_src>
import math

import numpy as np
import jax
import jax.numpy as jnp
from jax import lax
from jax.experimental import pallas as pl
from jax.experimental.pallas import tpu as pltpu

# ----- module-consistent configuration -----------------------------------------
B, L = 2, 8                 # batch, sequence length
E, H = 32, 32               # embedding_size, hidden_size
NL, NH = 2, 2               # num_layers, num_heads
KD, VD, F = 40, 40, 50      # total_key_depth, total_value_depth, filter_size
DK, DV = KD // NH, VD // NH
BL = B * L                  # batch folded into rows
G = NH * BL                 # (head, batch)-stacked attention rows
EPS = 1e-6                  # LayerNorm eps (added to std; torch-unbiased std)
NEG = -1e18                 # masked_fill value used by KEMP's MultiHeadAttention
SCALE = float(DK) ** -0.5

LANES = 128                 # lane-dense slab width
QW = 32                     # padded per-head q/k/v lane width (DK, DV <= 32)

# ----- f32 "misc" slab layout (rows x 128 lanes) ---------------------------------
C_TIM = E                   # timing signal lanes [E, E+H)
C_MPREV = E + H             # conv edge mask column: 1.0 where t != 0
C_MNEXT = E + H + 1         # conv edge mask column: 1.0 where t != L-1
R_BIAS = BL                 # attention bias rows [BL, BL+G)
R_VEC = BL + G              # small per-layer vectors, one (padded) row each
R_LN1G, R_LN1B, R_LN2G, R_LN2B, R_C1B, R_C2B = range(6)
VPL = 6                     # vector rows per layer
R_LNFG, R_LNFB = NL * VPL, NL * VPL + 1
MISC_ROWS = R_VEC + 16      # 64 rows total (>= R_VEC + NL*VPL + 2)

# ----- bf16 weight slab layout (row-packed, 128 lanes, 16-row aligned blocks) ----
WO_QKV0 = 0                 # head-0 fused [q*scale | k | v]   (H rows, lanes 0/32/64)
WO_QKV1 = H                 # head-1 fused [q*scale | k | v]   (H rows)
WO_OUT = 2 * H              # fused per-head output proj       (QW rows, 2H lanes)
WO_C1 = 2 * H + QW          # conv1 fused taps                 (3H rows, F lanes)
WO_C2 = WO_C1 + 3 * H       # conv2 fused taps                 (3F rows, H lanes)
C2_PAD = ((3 * F + 15) // 16) * 16        # 160: keep next block 16-row aligned (bf16)
W_LROWS = WO_C2 + C2_PAD                  # 352 rows per layer
W_LAYER0 = E                              # embedding_proj.weight^T in rows [0, E)
W_ROWS = W_LAYER0 + NL * W_LROWS          # 736 rows total

# static block-diagonal structure of the (head,batch)-stacked attention logits
_IDX = np.arange(G)
_SAME_BLK = (_IDX[:, None] // L) == (_IDX[None, :] // L)      # (G, G) bool, host const


# ----- sublane roll helper (direction probed once per process, then cached) ------
_SHIFT_ROWS = None


def _get_shift_rows():
    """shift_rows(z, k): result row t equals z[t - k] (np.roll semantics) along
    the sublane axis. Prefers the XLU pltpu.roll; its rotation direction is
    resolved ONCE with a tiny probe kernel and cached. jnp.roll is the
    (semantically guaranteed) fallback."""
    global _SHIFT_ROWS
    if _SHIFT_ROWS is not None:
        return _SHIFT_ROWS

    def roll_fwd(z, k):
        return pltpu.roll(z, k % z.shape[0], axis=0)

    def roll_bwd(z, k):
        return pltpu.roll(z, (-k) % z.shape[0], axis=0)

    def roll_jnp(z, k):
        return jnp.roll(z, k, axis=0)

    probe = np.arange(8 * 128, dtype=np.float32).reshape(8, 128)
    chosen = roll_jnp
    try:
        def probe_kernel(x_ref, o_ref):
            o_ref[...] = pltpu.roll(x_ref[...], 1, axis=0)

        got = np.asarray(pl.pallas_call(
            probe_kernel,
            out_shape=jax.ShapeDtypeStruct((8, 128), jnp.float32),
        )(jnp.asarray(probe)))
        if np.array_equal(got, np.roll(probe, 1, axis=0)):
            chosen = roll_fwd
        elif np.array_equal(got, np.roll(probe, -1, axis=0)):
            chosen = roll_bwd
    except Exception:
        chosen = roll_jnp
    _SHIFT_ROWS = chosen
    return chosen


# ----- Pallas kernel --------------------------------------------------------------
def make_encoder_kernel(shift_rows):
    f32, bf16 = jnp.float32, jnp.bfloat16

    def mdot(a, b):
        # bf16 MXU operands, f32 accumulation
        return jnp.dot(a.astype(bf16), b.astype(bf16), preferred_element_type=f32)

    def encoder_kernel(misc_ref, wts_ref, out_ref):
        def vrow(r, width):
            return misc_ref[R_VEC + r:R_VEC + r + 1, 0:width]          # (1, width) f32

        def layer_norm(x, g, b):
            # gamma*(x-mean)/(std+eps)+beta with torch-unbiased (N-1) std
            mean = jnp.mean(x, axis=-1, keepdims=True)
            d = x - mean
            var = jnp.sum(d * d, axis=-1, keepdims=True) * (1.0 / (H - 1))
            inv = pl.reciprocal(jnp.sqrt(var) + EPS, approx=True)      # EUP, not VPU div
            return g * (d * inv) + b

        # host-precomputed constants (DMA'd inside the misc slab)
        timing = misc_ref[0:BL, C_TIM:C_TIM + H]                       # (BL, H)
        m_prev = misc_ref[0:BL, C_MPREV:C_MPREV + 1]                   # (BL, 1)
        m_next = misc_ref[0:BL, C_MNEXT:C_MNEXT + 1]                   # (BL, 1)
        bias = misc_ref[R_BIAS:R_BIAS + G, 0:G]                        # (G, G)

        def conv3(z, w, brow):
            # Conv1d(k=3, pad 'both'): one fused matmul against [tap0; tap1; tap2]
            zp = shift_rows(z, 1) * m_prev         # z[t-1], zeroed at sequence start
            zn = shift_rows(z, -1) * m_next        # z[t+1], zeroed at sequence end
            zcat = jnp.concatenate([zp, z, zn], axis=-1)               # (BL, 3W)
            return mdot(zcat, w) + brow

        # input_dropout(p=0) == identity; embedding_proj (no bias); + timing signal
        x = mdot(misc_ref[0:BL, 0:E], wts_ref[0:E, 0:H]) + timing      # (BL, H) f32

        for l in range(NL):
            w0 = W_LAYER0 + l * W_LROWS
            rv = l * VPL

            # ===== pre-LN multi-head self-attention + residual ===================
            xn = layer_norm(x, vrow(rv + R_LN1G, H), vrow(rv + R_LN1B, H))
            # per-head fused QKV (q pre-scaled); heads stacked along sublanes via a
            # lane-aligned concat of two full-width (BL,128) matmul results
            qkv = jnp.concatenate(
                [mdot(xn, wts_ref[w0 + WO_QKV0:w0 + WO_QKV0 + H, :]),
                 mdot(xn, wts_ref[w0 + WO_QKV1:w0 + WO_QKV1 + H, :])], axis=0)
            q_s = qkv[:, 0:QW]                       # real q in lanes 0:DK, rest 0
            k_s = qkv[:, QW:2 * QW]                  # real k in lanes 0:DK, rest 0
            v_s = qkv[:, 2 * QW:3 * QW]              # real v in lanes 0:DV, rest 0
            logits = lax.dot_general(
                q_s.astype(jnp.bfloat16), k_s.astype(jnp.bfloat16),
                (((1,), (1,)), ((), ())),
                preferred_element_type=jnp.float32) + bias             # (G, G)
            mx = jnp.max(logits, axis=-1, keepdims=True)
            ex = jnp.exp(logits - mx)                # attention_dropout == 0
            attn = ex * pl.reciprocal(jnp.sum(ex, axis=-1, keepdims=True), approx=True)
            ctx = mdot(attn, v_s)                    # (G, QW) head-stacked context
            # fused per-head output projection: one matmul, two cheap slices + add
            r = mdot(ctx, wts_ref[w0 + WO_OUT:w0 + WO_OUT + QW, 0:2 * H])   # (G, 2H)
            x = x + r[0:BL, 0:H] + r[BL:G, H:2 * H]  # layer_dropout == 0

            # ===== position-wise FFN: Conv1d(k=3, pad 'both') -> ReLU, twice ======
            xn = layer_norm(x, vrow(rv + R_LN2G, H), vrow(rv + R_LN2B, H))
            h1 = jax.nn.relu(conv3(
                xn, wts_ref[w0 + WO_C1:w0 + WO_C1 + 3 * H, 0:F], vrow(rv + R_C1B, F)))
            # NOTE: the reference PositionwiseFeedForward applies ReLU after the LAST
            # conv as well (its `if i < len(self.layers)` is always true); relu_dropout=0
            h2 = jax.nn.relu(conv3(
                h1, wts_ref[w0 + WO_C2:w0 + WO_C2 + 3 * F, 0:H], vrow(rv + R_C2B, H)))
            x = x + h2                               # layer_dropout == 0

        out_ref[...] = layer_norm(x, vrow(R_LNFG, H), vrow(R_LNFB, H))

    return encoder_kernel


# ----- jit'd wrapper (slab assembly + grid-less pallas_call) ----------------------
_ENCODER_FN = None


def _get_encoder_fn():
    global _ENCODER_FN
    if _ENCODER_FN is not None:
        return _ENCODER_FN
    kernel = make_encoder_kernel(_get_shift_rows())

    @jax.jit
    def fn(inputs, mask, row0_tail, vec, wts):
        x_flat = inputs.reshape(BL, E).astype(jnp.float32)
        # KEMP mask semantics: 1.0 marks PAD key positions; replicate over the NH
        # head-stacked key-column groups and fold into an additive (G,G) bias
        # outside the kernel (the kernel does no iota/compare work).
        mask_cols = jnp.tile(mask.reshape(1, BL).astype(jnp.float32), (1, NH))  # (1, G)
        bias = jnp.where(jnp.asarray(_SAME_BLK), mask_cols * NEG, NEG)          # (G, G)
        misc = jnp.concatenate(
            [jnp.concatenate([x_flat, row0_tail], axis=1),          # x | timing | masks
             jnp.pad(bias, ((0, 0), (0, LANES - G))),                # bias rows
             vec], axis=0)                                           # LN / conv vectors
        out = pl.pallas_call(            # grid-less: whole-array VMEM refs, no pipeline
            kernel,
            out_shape=jax.ShapeDtypeStruct((BL, H), jnp.float32),
        )(misc, wts)
        return out.reshape(B, L, H)

    _ENCODER_FN = fn
    return _ENCODER_FN


def encoder_pallas(inputs, mask, packed):
    return _get_encoder_fn()(inputs, mask, packed["row0_tail"], packed["vec"],
                             packed["wts"])


# ----- host-side parameter packing (two DMA slabs for the kernel) -----------------
def pack_params(p):
    f32 = np.float32

    # static part of misc row block 0: timing signal + conv edge masks
    row0_tail = np.zeros((BL, LANES - E), f32)
    row0_tail[:, 0:H] = np.tile(np.asarray(p["timing"], f32), (B, 1))
    t_pos = np.arange(BL) % L
    row0_tail[:, C_MPREV - E] = (t_pos != 0).astype(f32)
    row0_tail[:, C_MNEXT - E] = (t_pos != L - 1).astype(f32)

    # small-vector rows (LayerNorm gammas/betas, conv biases)
    vec = np.zeros((MISC_ROWS - R_VEC, LANES), f32)
    for l in range(NL):
        r0 = l * VPL
        vec[r0 + R_LN1G, 0:H] = np.asarray(p["ln1_g"][l, 0])
        vec[r0 + R_LN1B, 0:H] = np.asarray(p["ln1_b"][l, 0])
        vec[r0 + R_LN2G, 0:H] = np.asarray(p["ln2_g"][l, 0])
        vec[r0 + R_LN2B, 0:H] = np.asarray(p["ln2_b"][l, 0])
        vec[r0 + R_C1B, 0:F] = np.asarray(p["c1b"][l, 0])
        vec[r0 + R_C2B, 0:H] = np.asarray(p["c2b"][l, 0])
    vec[R_LNFG, 0:H] = np.asarray(p["lnf_g"][0])
    vec[R_LNFB, 0:H] = np.asarray(p["lnf_b"][0])

    # bf16 weight slab (row-packed, 128 lanes)
    wts = np.zeros((W_ROWS, LANES), f32)
    wts[0:E, 0:H] = np.asarray(p["emb_w_t"])
    for l in range(NL):
        w0 = W_LAYER0 + l * W_LROWS
        for h in range(NH):
            r = w0 + (WO_QKV0 if h == 0 else WO_QKV1)
            wts[r:r + H, 0:DK] = np.asarray(p["wq_t"][l][:, h * DK:(h + 1) * DK]) * SCALE
            wts[r:r + H, QW:QW + DK] = np.asarray(p["wk_t"][l][:, h * DK:(h + 1) * DK])
            wts[r:r + H, 2 * QW:2 * QW + DV] = np.asarray(
                p["wv_t"][l][:, h * DV:(h + 1) * DV])
        r = w0 + WO_OUT
        for h in range(NH):
            wts[r:r + DV, h * H:(h + 1) * H] = np.asarray(
                p["wo_t"][l][h * DV:(h + 1) * DV, :])
        r = w0 + WO_C1
        wts[r:r + 3 * H, 0:F] = np.asarray(p["c1w"][l]).reshape(3 * H, F)
        r = w0 + WO_C2
        wts[r:r + 3 * F, 0:H] = np.asarray(p["c2w"][l]).reshape(3 * F, H)

    return dict(row0_tail=jnp.asarray(row0_tail),
                vec=jnp.asarray(vec),
                wts=jnp.asarray(wts, jnp.bfloat16))


# ----- pure-JAX reference (unfused, per-batch / per-head, f32 params) -------------
def encoder_ref(inputs, mask, p):
    def layer_norm(x, g, b):
        mean = jnp.mean(x, axis=-1, keepdims=True)
        var = jnp.sum((x - mean) ** 2, axis=-1, keepdims=True) / (x.shape[-1] - 1)
        return g * (x - mean) / (jnp.sqrt(var) + EPS) + b

    def conv3(z, w3, b):
        zero = jnp.zeros((1, z.shape[1]), jnp.float32)
        zp = jnp.concatenate([zero, z[:-1]], axis=0)
        zn = jnp.concatenate([z[1:], zero], axis=0)
        return zp @ w3[0] + z @ w3[1] + zn @ w3[2] + b

    outs = []
    with jax.default_matmul_precision("highest"):
        for bi in range(B):
            x = inputs[bi] @ p["emb_w_t"] + p["timing"]
            mask_row = mask[bi]                                     # (1, L)
            for l in range(NL):
                xn = layer_norm(x, p["ln1_g"][l], p["ln1_b"][l])
                q = xn @ p["wq_t"][l]
                k = xn @ p["wk_t"][l]
                v = xn @ p["wv_t"][l]
                y = jnp.zeros((L, H), jnp.float32)
                for h in range(NH):
                    qh = q[:, h * DK:(h + 1) * DK] * SCALE
                    kh = k[:, h * DK:(h + 1) * DK]
                    vh = v[:, h * DV:(h + 1) * DV]
                    logits = jnp.where(mask_row > 0.5, NEG, qh @ kh.T)
                    attn = jax.nn.softmax(logits, axis=-1)
                    y = y + (attn @ vh) @ p["wo_t"][l][h * DV:(h + 1) * DV, :]
                x = x + y
                xn = layer_norm(x, p["ln2_g"][l], p["ln2_b"][l])
                h1 = jax.nn.relu(conv3(xn, p["c1w"][l], p["c1b"][l]))
                h2 = jax.nn.relu(conv3(h1, p["c2w"][l], p["c2b"][l]))
                x = x + h2
            outs.append(layer_norm(x, p["lnf_g"], p["lnf_b"]))
    return jnp.stack(outs, axis=0)


# ----- deterministic parameter / signal construction ------------------------------
def gen_timing_signal(length, channels, min_timescale=1.0, max_timescale=1.0e4):
    position = np.arange(length)
    num_timescales = channels // 2
    log_inc = math.log(float(max_timescale) / float(min_timescale)) / (num_timescales - 1)
    inv_timescales = min_timescale * np.exp(
        np.arange(num_timescales).astype(np.float64) * -log_inc)
    scaled_time = position[:, None] * inv_timescales[None, :]
    signal = np.concatenate([np.sin(scaled_time), np.cos(scaled_time)], axis=1)
    signal = np.pad(signal, [[0, 0], [0, channels % 2]])
    return jnp.asarray(signal, dtype=jnp.float32)            # (length, channels)


def make_params(key):
    ks = iter(jax.random.split(key, 32))

    def w(shape, scale=0.1):
        return (scale * jax.random.normal(next(ks), shape)).astype(jnp.float32)

    p = {}
    p["emb_w_t"] = w((E, H))                                  # embedding_proj.weight^T
    p["timing"] = gen_timing_signal(L, H)                     # timing_signal[0, :L, :]
    p["ln1_g"] = jnp.ones((NL, 1, H), jnp.float32) + w((NL, 1, H), 0.05)
    p["ln1_b"] = w((NL, 1, H), 0.05)
    p["wq_t"] = w((NL, H, KD))                                # query_linear.weight^T
    p["wk_t"] = w((NL, H, KD))
    p["wv_t"] = w((NL, H, VD))
    p["wo_t"] = w((NL, VD, H))                                # output_linear.weight^T
    p["ln2_g"] = jnp.ones((NL, 1, H), jnp.float32) + w((NL, 1, H), 0.05)
    p["ln2_b"] = w((NL, 1, H), 0.05)
    p["c1w"] = w((NL, 3, H, F))                               # conv1 W[:, :, k]^T per tap
    p["c1b"] = w((NL, 1, F), 0.05)
    p["c2w"] = w((NL, 3, F, H))
    p["c2b"] = w((NL, 1, H), 0.05)
    p["lnf_g"] = jnp.ones((1, H), jnp.float32) + w((1, H), 0.05)
    p["lnf_b"] = w((1, H), 0.05)
    return p


if __name__ == "__main__":
    key = jax.random.PRNGKey(0)
    k_param, k_in = jax.random.split(key)
    params = make_params(k_param)
    packed = pack_params(params)

    inputs = jax.random.normal(k_in, (B, L, E), jnp.float32)
    # KEMP mask semantics: True(=1.0) marks PAD key positions; shape (B, 1, L)
    mask_np = np.zeros((B, 1, L), np.float32)
    mask_np[1, 0, -3:] = 1.0
    mask = jnp.asarray(mask_np)

    out = encoder_pallas(inputs, mask, packed)
    jax.block_until_ready(out)

    ref = encoder_ref(inputs, mask, params)
    np.testing.assert_allclose(np.asarray(out), np.asarray(ref),
                               rtol=5e-2, atol=5e-2)
    assert out.shape == (B, L, H) and bool(jnp.all(jnp.isfinite(out)))
    print("KERNEL_OK")
</pallas_src>

<mosaic_0001>
module attributes {stable_mosaic.version = 11 : i64} {
  func.func @probe_kernel(%arg0: memref<8x128xf32, #tpu.memory_space<vmem>>, %arg1: memref<8x128xf32, #tpu.memory_space<vmem>>) attributes {dimension_semantics = [], scalar_prefetch = 0 : i64, scratch_operands = 0 : i64, tpu.core_type = #tpu.core_type<tc>} {
    %c0 = arith.constant 0 : index
    %c0_0 = arith.constant 0 : index
    %0 = vector.load %arg0[%c0, %c0_0] : memref<8x128xf32, #tpu.memory_space<vmem>>, vector<8x128xf32>
    %c1_i32 = arith.constant 1 : i32
    %1 = tpu.dynamic_rotate %0 by %c1_i32 dim 0 : vector<8x128xf32>, i32 -> vector<8x128xf32>
    %c0_1 = arith.constant 0 : index
    %c0_2 = arith.constant 0 : index
    %2 = vector.load %arg1[%c0_1, %c0_2] : memref<8x128xf32, #tpu.memory_space<vmem>>, vector<8x128xf32>
    tpu.vector_store %arg1[%c0_1, %c0_2], %1 {strides = array<i32>} : memref<8x128xf32, #tpu.memory_space<vmem>>, vector<8x128xf32>,
    return
  }
}

module attributes {stable_mosaic.version = 11 : i64} {
  func.func @encoder_kernel(%arg0: memref<64x128xf32, #tpu.memory_space<vmem>>, %arg1: memref<736x128xbf16, #tpu.memory_space<vmem>>, %arg2: memref<16x32xf32, #tpu.memory_space<vmem>>) attributes {dimension_semantics = [], scalar_prefetch = 0 : i64, scratch_operands = 0 : i64, tpu.core_type = #tpu.core_type<tc>} {
    %c0 = arith.constant 0 : index
    %c32 = arith.constant 32 : index
    %0 = vector.load %arg0[%c0, %c32] : memref<64x128xf32, #tpu.memory_space<vmem>>, vector<16x32xf32>
    %c0_0 = arith.constant 0 : index
    %c64 = arith.constant 64 : index
    %1 = vector.load %arg0[%c0_0, %c64] : memref<64x128xf32, #tpu.memory_space<vmem>>, vector<16x1xf32>
    %c0_1 = arith.constant 0 : index
    %c65 = arith.constant 65 : index
    %2 = vector.load %arg0[%c0_1, %c65] : memref<64x128xf32, #tpu.memory_space<vmem>>, vector<16x1xf32>
    %c16 = arith.constant 16 : index
    %c0_2 = arith.constant 0 : index
    %3 = vector.load %arg0[%c16, %c0_2] : memref<64x128xf32, #tpu.memory_space<vmem>>, vector<32x32xf32>
    %c0_3 = arith.constant 0 : index
    %c0_4 = arith.constant 0 : index
    %4 = vector.load %arg0[%c0_3, %c0_4] : memref<64x128xf32, #tpu.memory_space<vmem>>, vector<16x32xf32>
    %c0_5 = arith.constant 0 : index
    %c0_6 = arith.constant 0 : index
    %5 = vector.load %arg1[%c0_5, %c0_6] : memref<736x128xbf16, #tpu.memory_space<vmem>>, vector<32x32xbf16>
    %6 = arith.truncf %4 : vector<16x32xf32> to vector<16x32xbf16>
    %cst = arith.constant dense<0.000000e+00> : vector<16x32xf32>
    %7 = tpu.matmul %6, %5, %cst {dimension_numbers = #tpu.dot_dimension_numbers<[1], [0], [0], [1], [0, 0, 1, 1], [], []>} : vector<16x32xbf16>, vector<32x32xbf16>, vector<16x32xf32> -> vector<16x32xf32>
    %8 = arith.addf %7, %0 : vector<16x32xf32>
    %c48 = arith.constant 48 : index
    %c0_7 = arith.constant 0 : index
    %9 = vector.load %arg0[%c48, %c0_7] : memref<64x128xf32, #tpu.memory_space<vmem>>, vector<1x32xf32>
    %c49 = arith.constant 49 : index
    %c0_8 = arith.constant 0 : index
    %10 = vector.load %arg0[%c49, %c0_8] : memref<64x128xf32, #tpu.memory_space<vmem>>, vector<1x32xf32>
    %cst_9 = arith.constant dense<0.000000e+00> : vector<16xf32>
    %11 = vector.multi_reduction <add>, %8, %cst_9 [1] : vector<16x32xf32> to vector<16xf32>
    %12 = vector.shape_cast %11 : vector<16xf32> to vector<16x1xf32>
    %cst_10 = arith.constant 3.200000e+01 : f32
    %13 = vector.broadcast %cst_10 : f32 to vector<16x1xf32>
    %14 = arith.divf %12, %13 : vector<16x1xf32>
    %15 = vector.broadcast %14 : vector<16x1xf32> to vector<16x32xf32>
    %16 = arith.subf %8, %15 : vector<16x32xf32>
    %17 = arith.mulf %16, %16 : vector<16x32xf32>
    %cst_11 = arith.constant dense<0.000000e+00> : vector<16xf32>
    %18 = vector.multi_reduction <add>, %17, %cst_11 [1] : vector<16x32xf32> to vector<16xf32>
    %19 = vector.shape_cast %18 : vector<16xf32> to vector<16x1xf32>
    %cst_12 = arith.constant 0.0322580636 : f32
    %20 = vector.broadcast %cst_12 : f32 to vector<16x1xf32>
    %21 = arith.mulf %19, %20 : vector<16x1xf32>
    %22 = math.sqrt %21 : vector<16x1xf32>
    %cst_13 = arith.constant 9.99999997E-7 : f32
    %23 = vector.broadcast %cst_13 : f32 to vector<16x1xf32>
    %24 = arith.addf %22, %23 : vector<16x1xf32>
    %25 = tpu.reciprocal %24 {approx = true} : vector<16x1xf32> -> vector<16x1xf32>
    %26 = vector.broadcast %25 : vector<16x1xf32> to vector<16x32xf32>
    %27 = arith.mulf %16, %26 : vector<16x32xf32>
    %28 = vector.broadcast %9 : vector<1x32xf32> to vector<16x32xf32>
    %29 = arith.mulf %28, %27 : vector<16x32xf32>
    %30 = vector.broadcast %10 : vector<1x32xf32> to vector<16x32xf32>
    %31 = arith.addf %29, %30 : vector<16x32xf32>
    %c32_14 = arith.constant 32 : index
    %c0_15 = arith.constant 0 : index
    %32 = vector.load %arg1[%c32_14, %c0_15] : memref<736x128xbf16, #tpu.memory_space<vmem>>, vector<32x128xbf16>
    %33 = arith.truncf %31 : vector<16x32xf32> to vector<16x32xbf16>
    %cst_16 = arith.constant dense<0.000000e+00> : vector<16x128xf32>
    %34 = tpu.matmul %33, %32, %cst_16 {dimension_numbers = #tpu.dot_dimension_numbers<[1], [0], [0], [1], [0, 0, 1, 1], [], []>} : vector<16x32xbf16>, vector<32x128xbf16>, vector<16x128xf32> -> vector<16x128xf32>
    %c64_17 = arith.constant 64 : index
    %c0_18 = arith.constant 0 : index
    %35 = vector.load %arg1[%c64_17, %c0_18] : memref<736x128xbf16, #tpu.memory_space<vmem>>, vector<32x128xbf16>
    %36 = arith.truncf %31 : vector<16x32xf32> to vector<16x32xbf16>
    %cst_19 = arith.constant dense<0.000000e+00> : vector<16x128xf32>
    %37 = tpu.matmul %36, %35, %cst_19 {dimension_numbers = #tpu.dot_dimension_numbers<[1], [0], [0], [1], [0, 0, 1, 1], [], []>} : vector<16x32xbf16>, vector<32x128xbf16>, vector<16x128xf32> -> vector<16x128xf32>
    %38 = tpu.concatenate %34, %37 in 0 : vector<16x128xf32>, vector<16x128xf32> -> vector<32x128xf32>
    %39 = vector.extract_strided_slice %38 {offsets = [0, 0], sizes = [32, 32], strides = [1, 1]} : vector<32x128xf32> to vector<32x32xf32>
    %40 = vector.extract_strided_slice %38 {offsets = [0, 32], sizes = [32, 32], strides = [1, 1]} : vector<32x128xf32> to vector<32x32xf32>
    %41 = vector.extract_strided_slice %38 {offsets = [0, 64], sizes = [32, 32], strides = [1, 1]} : vector<32x128xf32> to vector<32x32xf32>
    %42 = arith.truncf %39 : vector<32x32xf32> to vector<32x32xbf16>
    %43 = arith.truncf %40 : vector<32x32xf32> to vector<32x32xbf16>
    %cst_20 = arith.constant dense<0.000000e+00> : vector<32x32xf32>
    %44 = tpu.matmul %42, %43, %cst_20 {dimension_numbers = #tpu.dot_dimension_numbers<[1], [1], [0], [0], [0, 0, 1, 0], [], []>} : vector<32x32xbf16>, vector<32x32xbf16>, vector<32x32xf32> -> vector<32x32xf32>
    %45 = arith.addf %44, %3 : vector<32x32xf32>
    %cst_21 = arith.constant dense<0xFF800000> : vector<32xf32>
    %46 = vector.multi_reduction <maximumf>, %45, %cst_21 [1] : vector<32x32xf32> to vector<32xf32>
    %47 = vector.shape_cast %46 : vector<32xf32> to vector<32x1xf32>
    %48 = vector.broadcast %47 : vector<32x1xf32> to vector<32x32xf32>
    %49 = arith.subf %45, %48 : vector<32x32xf32>
    %50 = math.exp %49 : vector<32x32xf32>
    %cst_22 = arith.constant dense<0.000000e+00> : vector<32xf32>
    %51 = vector.multi_reduction <add>, %50, %cst_22 [1] : vector<32x32xf32> to vector<32xf32>
    %52 = vector.shape_cast %51 : vector<32xf32> to vector<32x1xf32>
    %53 = tpu.reciprocal %52 {approx = true} : vector<32x1xf32> -> vector<32x1xf32>
    %54 = vector.broadcast %53 : vector<32x1xf32> to vector<32x32xf32>
    %55 = arith.mulf %50, %54 : vector<32x32xf32>
    %56 = arith.truncf %55 : vector<32x32xf32> to vector<32x32xbf16>
    %57 = arith.truncf %41 : vector<32x32xf32> to vector<32x32xbf16>
    %cst_23 = arith.constant dense<0.000000e+00> : vector<32x32xf32>
    %58 = tpu.matmul %56, %57, %cst_23 {dimension_numbers = #tpu.dot_dimension_numbers<[1], [0], [0], [1], [0, 0, 1, 1], [], []>} : vector<32x32xbf16>, vector<32x32xbf16>, vector<32x32xf32> -> vector<32x32xf32>
    %c96 = arith.constant 96 : index
    %c0_24 = arith.constant 0 : index
    %59 = vector.load %arg1[%c96, %c0_24] : memref<736x128xbf16, #tpu.memory_space<vmem>>, vector<32x64xbf16>
    %60 = arith.truncf %58 : vector<32x32xf32> to vector<32x32xbf16>
    %cst_25 = arith.constant dense<0.000000e+00> : vector<32x64xf32>
    %61 = tpu.matmul %60, %59, %cst_25 {dimension_numbers = #tpu.dot_dimension_numbers<[1], [0], [0], [1], [0, 0, 1, 1], [], []>} : vector<32x32xbf16>, vector<32x64xbf16>, vector<32x64xf32> -> vector<32x64xf32>
    %62 = vector.extract_strided_slice %61 {offsets = [0, 0], sizes = [16, 32], strides = [1, 1]} : vector<32x64xf32> to vector<16x32xf32>
    %63 = arith.addf %8, %62 : vector<16x32xf32>
    %64 = vector.extract_strided_slice %61 {offsets = [16, 32], sizes = [16, 32], strides = [1, 1]} : vector<32x64xf32> to vector<16x32xf32>
    %65 = arith.addf %63, %64 : vector<16x32xf32>
    %c50 = arith.constant 50 : index
    %c0_26 = arith.constant 0 : index
    %66 = vector.load %arg0[%c50, %c0_26] : memref<64x128xf32, #tpu.memory_space<vmem>>, vector<1x32xf32>
    %c51 = arith.constant 51 : index
    %c0_27 = arith.constant 0 : index
    %67 = vector.load %arg0[%c51, %c0_27] : memref<64x128xf32, #tpu.memory_space<vmem>>, vector<1x32xf32>
    %cst_28 = arith.constant dense<0.000000e+00> : vector<16xf32>
    %68 = vector.multi_reduction <add>, %65, %cst_28 [1] : vector<16x32xf32> to vector<16xf32>
    %69 = vector.shape_cast %68 : vector<16xf32> to vector<16x1xf32>
    %cst_29 = arith.constant 3.200000e+01 : f32
    %70 = vector.broadcast %cst_29 : f32 to vector<16x1xf32>
    %71 = arith.divf %69, %70 : vector<16x1xf32>
    %72 = vector.broadcast %71 : vector<16x1xf32> to vector<16x32xf32>
    %73 = arith.subf %65, %72 : vector<16x32xf32>
    %74 = arith.mulf %73, %73 : vector<16x32xf32>
    %cst_30 = arith.constant dense<0.000000e+00> : vector<16xf32>
    %75 = vector.multi_reduction <add>, %74, %cst_30 [1] : vector<16x32xf32> to vector<16xf32>
    %76 = vector.shape_cast %75 : vector<16xf32> to vector<16x1xf32>
    %cst_31 = arith.constant 0.0322580636 : f32
    %77 = vector.broadcast %cst_31 : f32 to vector<16x1xf32>
    %78 = arith.mulf %76, %77 : vector<16x1xf32>
    %79 = math.sqrt %78 : vector<16x1xf32>
    %cst_32 = arith.constant 9.99999997E-7 : f32
    %80 = vector.broadcast %cst_32 : f32 to vector<16x1xf32>
    %81 = arith.addf %79, %80 : vector<16x1xf32>
    %82 = tpu.reciprocal %81 {approx = true} : vector<16x1xf32> -> vector<16x1xf32>
    %83 = vector.broadcast %82 : vector<16x1xf32> to vector<16x32xf32>
    %84 = arith.mulf %73, %83 : vector<16x32xf32>
    %85 = vector.broadcast %66 : vector<1x32xf32> to vector<16x32xf32>
    %86 = arith.mulf %85, %84 : vector<16x32xf32>
    %87 = vector.broadcast %67 : vector<1x32xf32> to vector<16x32xf32>
    %88 = arith.addf %86, %87 : vector<16x32xf32>
    %c128 = arith.constant 128 : index
    %c0_33 = arith.constant 0 : index
    %89 = vector.load %arg1[%c128, %c0_33] : memref<736x128xbf16, #tpu.memory_space<vmem>>, vector<96x50xbf16>
    %c52 = arith.constant 52 : index
    %c0_34 = arith.constant 0 : index
    %90 = vector.load %arg0[%c52, %c0_34] : memref<64x128xf32, #tpu.memory_space<vmem>>, vector<1x50xf32>
    %91 = vector.extract_strided_slice %88 {offsets = [15, 0], sizes = [1, 32], strides = [1, 1]} : vector<16x32xf32> to vector<1x32xf32>
    %92 = vector.extract_strided_slice %88 {offsets = [0, 0], sizes = [15, 32], strides = [1, 1]} : vector<16x32xf32> to vector<15x32xf32>
    %93 = tpu.concatenate %91, %92 in 0 : vector<1x32xf32>, vector<15x32xf32> -> vector<16x32xf32>
    %94 = vector.broadcast %1 : vector<16x1xf32> to vector<16x32xf32>
    %95 = arith.mulf %93, %94 : vector<16x32xf32>
    %96 = vector.extract_strided_slice %88 {offsets = [1, 0], sizes = [15, 32], strides = [1, 1]} : vector<16x32xf32> to vector<15x32xf32>
    %97 = vector.extract_strided_slice %88 {offsets = [0, 0], sizes = [1, 32], strides = [1, 1]} : vector<16x32xf32> to vector<1x32xf32>
    %98 = tpu.concatenate %96, %97 in 0 : vector<15x32xf32>, vector<1x32xf32> -> vector<16x32xf32>
    %99 = vector.broadcast %2 : vector<16x1xf32> to vector<16x32xf32>
    %100 = arith.mulf %98, %99 : vector<16x32xf32>
    %101 = tpu.concatenate %95, %88, %100 in 1 : vector<16x32xf32>, vector<16x32xf32>, vector<16x32xf32> -> vector<16x96xf32>
    %102 = arith.truncf %101 : vector<16x96xf32> to vector<16x96xbf16>
    %cst_35 = arith.constant dense<0.000000e+00> : vector<16x50xf32>
    %103 = tpu.matmul %102, %89, %cst_35 {dimension_numbers = #tpu.dot_dimension_numbers<[1], [0], [0], [1], [0, 0, 1, 1], [], []>} : vector<16x96xbf16>, vector<96x50xbf16>, vector<16x50xf32> -> vector<16x50xf32>
    %104 = vector.broadcast %90 : vector<1x50xf32> to vector<16x50xf32>
    %105 = arith.addf %103, %104 : vector<16x50xf32>
    %cst_36 = arith.constant 0.000000e+00 : f32
    %106 = vector.broadcast %cst_36 : f32 to vector<16x50xf32>
    %107 = arith.maximumf %105, %106 : vector<16x50xf32>
    %c224 = arith.constant 224 : index
    %c0_37 = arith.constant 0 : index
    %108 = vector.load %arg1[%c224, %c0_37] : memref<736x128xbf16, #tpu.memory_space<vmem>>, vector<150x32xbf16>
    %c53 = arith.constant 53 : index
    %c0_38 = arith.constant 0 : index
    %109 = vector.load %arg0[%c53, %c0_38] : memref<64x128xf32, #tpu.memory_space<vmem>>, vector<1x32xf32>
    %110 = vector.extract_strided_slice %107 {offsets = [15, 0], sizes = [1, 50], strides = [1, 1]} : vector<16x50xf32> to vector<1x50xf32>
    %111 = vector.extract_strided_slice %107 {offsets = [0, 0], sizes = [15, 50], strides = [1, 1]} : vector<16x50xf32> to vector<15x50xf32>
    %112 = tpu.concatenate %110, %111 in 0 : vector<1x50xf32>, vector<15x50xf32> -> vector<16x50xf32>
    %113 = vector.broadcast %1 : vector<16x1xf32> to vector<16x50xf32>
    %114 = arith.mulf %112, %113 : vector<16x50xf32>
    %115 = vector.extract_strided_slice %107 {offsets = [1, 0], sizes = [15, 50], strides = [1, 1]} : vector<16x50xf32> to vector<15x50xf32>
    %116 = vector.extract_strided_slice %107 {offsets = [0, 0], sizes = [1, 50], strides = [1, 1]} : vector<16x50xf32> to vector<1x50xf32>
    %117 = tpu.concatenate %115, %116 in 0 : vector<15x50xf32>, vector<1x50xf32> -> vector<16x50xf32>
    %118 = vector.broadcast %2 : vector<16x1xf32> to vector<16x50xf32>
    %119 = arith.mulf %117, %118 : vector<16x50xf32>
    %120 = tpu.concatenate %114, %107, %119 in 1 : vector<16x50xf32>, vector<16x50xf32>, vector<16x50xf32> -> vector<16x150xf32>
    %121 = arith.truncf %120 : vector<16x150xf32> to vector<16x150xbf16>
    %cst_39 = arith.constant dense<0.000000e+00> : vector<16x32xf32>
    %122 = tpu.matmul %121, %108, %cst_39 {dimension_numbers = #tpu.dot_dimension_numbers<[1], [0], [0], [1], [0, 0, 1, 1], [], []>} : vector<16x150xbf16>, vector<150x32xbf16>, vector<16x32xf32> -> vector<16x32xf32>
    %123 = vector.broadcast %109 : vector<1x32xf32> to vector<16x32xf32>
    %124 = arith.addf %122, %123 : vector<16x32xf32>
    %cst_40 = arith.constant 0.000000e+00 : f32
    %125 = vector.broadcast %cst_40 : f32 to vector<16x32xf32>
    %126 = arith.maximumf %124, %125 : vector<16x32xf32>
    %127 = arith.addf %65, %126 : vector<16x32xf32>
    %c54 = arith.constant 54 : index
    %c0_41 = arith.constant 0 : index
    %128 = vector.load %arg0[%c54, %c0_41] : memref<64x128xf32, #tpu.memory_space<vmem>>, vector<1x32xf32>
    %c55 = arith.constant 55 : index
    %c0_42 = arith.constant 0 : index
    %129 = vector.load %arg0[%c55, %c0_42] : memref<64x128xf32, #tpu.memory_space<vmem>>, vector<1x32xf32>
    %cst_43 = arith.constant dense<0.000000e+00> : vector<16xf32>
    %130 = vector.multi_reduction <add>, %127, %cst_43 [1] : vector<16x32xf32> to vector<16xf32>
    %131 = vector.shape_cast %130 : vector<16xf32> to vector<16x1xf32>
    %cst_44 = arith.constant 3.200000e+01 : f32
    %132 = vector.broadcast %cst_44 : f32 to vector<16x1xf32>
    %133 = arith.divf %131, %132 : vector<16x1xf32>
    %134 = vector.broadcast %133 : vector<16x1xf32> to vector<16x32xf32>
    %135 = arith.subf %127, %134 : vector<16x32xf32>
    %136 = arith.mulf %135, %135 : vector<16x32xf32>
    %cst_45 = arith.constant dense<0.000000e+00> : vector<16xf32>
    %137 = vector.multi_reduction <add>, %136, %cst_45 [1] : vector<16x32xf32> to vector<16xf32>
    %138 = vector.shape_cast %137 : vector<16xf32> to vector<16x1xf32>
    %cst_46 = arith.constant 0.0322580636 : f32
    %139 = vector.broadcast %cst_46 : f32 to vector<16x1xf32>
    %140 = arith.mulf %138, %139 : vector<16x1xf32>
    %141 = math.sqrt %140 : vector<16x1xf32>
    %cst_47 = arith.constant 9.99999997E-7 : f32
    %142 = vector.broadcast %cst_47 : f32 to vector<16x1xf32>
    %143 = arith.addf %141, %142 : vector<16x1xf32>
    %144 = tpu.reciprocal %143 {approx = true} : vector<16x1xf32> -> vector<16x1xf32>
    %145 = vector.broadcast %144 : vector<16x1xf32> to vector<16x32xf32>
    %146 = arith.mulf %135, %145 : vector<16x32xf32>
    %147 = vector.broadcast %128 : vector<1x32xf32> to vector<16x32xf32>
    %148 = arith.mulf %147, %146 : vector<16x32xf32>
    %149 = vector.broadcast %129 : vector<1x32xf32> to vector<16x32xf32>
    %150 = arith.addf %148, %149 : vector<16x32xf32>
    %c384 = arith.constant 384 : index
    %c0_48 = arith.constant 0 : index
    %151 = vector.load %arg1[%c384, %c0_48] : memref<736x128xbf16, #tpu.memory_space<vmem>>, vector<32x128xbf16>
    %152 = arith.truncf %150 : vector<16x32xf32> to vector<16x32xbf16>
    %cst_49 = arith.constant dense<0.000000e+00> : vector<16x128xf32>
    %153 = tpu.matmul %152, %151, %cst_49 {dimension_numbers = #tpu.dot_dimension_numbers<[1], [0], [0], [1], [0, 0, 1, 1], [], []>} : vector<16x32xbf16>, vector<32x128xbf16>, vector<16x128xf32> -> vector<16x128xf32>
    %c416 = arith.constant 416 : index
    %c0_50 = arith.constant 0 : index
    %154 = vector.load %arg1[%c416, %c0_50] : memref<736x128xbf16, #tpu.memory_space<vmem>>, vector<32x128xbf16>
    %155 = arith.truncf %150 : vector<16x32xf32> to vector<16x32xbf16>
    %cst_51 = arith.constant dense<0.000000e+00> : vector<16x128xf32>
    %156 = tpu.matmul %155, %154, %cst_51 {dimension_numbers = #tpu.dot_dimension_numbers<[1], [0], [0], [1], [0, 0, 1, 1], [], []>} : vector<16x32xbf16>, vector<32x128xbf16>, vector<16x128xf32> -> vector<16x128xf32>
    %157 = tpu.concatenate %153, %156 in 0 : vector<16x128xf32>, vector<16x128xf32> -> vector<32x128xf32>
    %158 = vector.extract_strided_slice %157 {offsets = [0, 0], sizes = [32, 32], strides = [1, 1]} : vector<32x128xf32> to vector<32x32xf32>
    %159 = vector.extract_strided_slice %157 {offsets = [0, 32], sizes = [32, 32], strides = [1, 1]} : vector<32x128xf32> to vector<32x32xf32>
    %160 = vector.extract_strided_slice %157 {offsets = [0, 64], sizes = [32, 32], strides = [1, 1]} : vector<32x128xf32> to vector<32x32xf32>
    %161 = arith.truncf %158 : vector<32x32xf32> to vector<32x32xbf16>
    %162 = arith.truncf %159 : vector<32x32xf32> to vector<32x32xbf16>
    %cst_52 = arith.constant dense<0.000000e+00> : vector<32x32xf32>
    %163 = tpu.matmul %161, %162, %cst_52 {dimension_numbers = #tpu.dot_dimension_numbers<[1], [1], [0], [0], [0, 0, 1, 0], [], []>} : vector<32x32xbf16>, vector<32x32xbf16>, vector<32x32xf32> -> vector<32x32xf32>
    %164 = arith.addf %163, %3 : vector<32x32xf32>
    %cst_53 = arith.constant dense<0xFF800000> : vector<32xf32>
    %165 = vector.multi_reduction <maximumf>, %164, %cst_53 [1] : vector<32x32xf32> to vector<32xf32>
    %166 = vector.shape_cast %165 : vector<32xf32> to vector<32x1xf32>
    %167 = vector.broadcast %166 : vector<32x1xf32> to vector<32x32xf32>
    %168 = arith.subf %164, %167 : vector<32x32xf32>
    %169 = math.exp %168 : vector<32x32xf32>
    %cst_54 = arith.constant dense<0.000000e+00> : vector<32xf32>
    %170 = vector.multi_reduction <add>, %169, %cst_54 [1] : vector<32x32xf32> to vector<32xf32>
    %171 = vector.shape_cast %170 : vector<32xf32> to vector<32x1xf32>
    %172 = tpu.reciprocal %171 {approx = true} : vector<32x1xf32> -> vector<32x1xf32>
    %173 = vector.broadcast %172 : vector<32x1xf32> to vector<32x32xf32>
    %174 = arith.mulf %169, %173 : vector<32x32xf32>
    %175 = arith.truncf %174 : vector<32x32xf32> to vector<32x32xbf16>
    %176 = arith.truncf %160 : vector<32x32xf32> to vector<32x32xbf16>
    %cst_55 = arith.constant dense<0.000000e+00> : vector<32x32xf32>
    %177 = tpu.matmul %175, %176, %cst_55 {dimension_numbers = #tpu.dot_dimension_numbers<[1], [0], [0], [1], [0, 0, 1, 1], [], []>} : vector<32x32xbf16>, vector<32x32xbf16>, vector<32x32xf32> -> vector<32x32xf32>
    %c448 = arith.constant 448 : index
    %c0_56 = arith.constant 0 : index
    %178 = vector.load %arg1[%c448, %c0_56] : memref<736x128xbf16, #tpu.memory_space<vmem>>, vector<32x64xbf16>
    %179 = arith.truncf %177 : vector<32x32xf32> to vector<32x32xbf16>
    %cst_57 = arith.constant dense<0.000000e+00> : vector<32x64xf32>
    %180 = tpu.matmul %179, %178, %cst_57 {dimension_numbers = #tpu.dot_dimension_numbers<[1], [0], [0], [1], [0, 0, 1, 1], [], []>} : vector<32x32xbf16>, vector<32x64xbf16>, vector<32x64xf32> -> vector<32x64xf32>
    %181 = vector.extract_strided_slice %180 {offsets = [0, 0], sizes = [16, 32], strides = [1, 1]} : vector<32x64xf32> to vector<16x32xf32>
    %182 = arith.addf %127, %181 : vector<16x32xf32>
    %183 = vector.extract_strided_slice %180 {offsets = [16, 32], sizes = [16, 32], strides = [1, 1]} : vector<32x64xf32> to vector<16x32xf32>
    %184 = arith.addf %182, %183 : vector<16x32xf32>
    %c56 = arith.constant 56 : index
    %c0_58 = arith.constant 0 : index
    %185 = vector.load %arg0[%c56, %c0_58] : memref<64x128xf32, #tpu.memory_space<vmem>>, vector<1x32xf32>
    %c57 = arith.constant 57 : index
    %c0_59 = arith.constant 0 : index
    %186 = vector.load %arg0[%c57, %c0_59] : memref<64x128xf32, #tpu.memory_space<vmem>>, vector<1x32xf32>
    %cst_60 = arith.constant dense<0.000000e+00> : vector<16xf32>
    %187 = vector.multi_reduction <add>, %184, %cst_60 [1] : vector<16x32xf32> to vector<16xf32>
    %188 = vector.shape_cast %187 : vector<16xf32> to vector<16x1xf32>
    %cst_61 = arith.constant 3.200000e+01 : f32
    %189 = vector.broadcast %cst_61 : f32 to vector<16x1xf32>
    %190 = arith.divf %188, %189 : vector<16x1xf32>
    %191 = vector.broadcast %190 : vector<16x1xf32> to vector<16x32xf32>
    %192 = arith.subf %184, %191 : vector<16x32xf32>
    %193 = arith.mulf %192, %192 : vector<16x32xf32>
    %cst_62 = arith.constant dense<0.000000e+00> : vector<16xf32>
    %194 = vector.multi_reduction <add>, %193, %cst_62 [1] : vector<16x32xf32> to vector<16xf32>
    %195 = vector.shape_cast %194 : vector<16xf32> to vector<16x1xf32>
    %cst_63 = arith.constant 0.0322580636 : f32
    %196 = vector.broadcast %cst_63 : f32 to vector<16x1xf32>
    %197 = arith.mulf %195, %196 : vector<16x1xf32>
    %198 = math.sqrt %197 : vector<16x1xf32>
    %cst_64 = arith.constant 9.99999997E-7 : f32
    %199 = vector.broadcast %cst_64 : f32 to vector<16x1xf32>
    %200 = arith.addf %198, %199 : vector<16x1xf32>
    %201 = tpu.reciprocal %200 {approx = true} : vector<16x1xf32> -> vector<16x1xf32>
    %202 = vector.broadcast %201 : vector<16x1xf32> to vector<16x32xf32>
    %203 = arith.mulf %192, %202 : vector<16x32xf32>
    %204 = vector.broadcast %185 : vector<1x32xf32> to vector<16x32xf32>
    %205 = arith.mulf %204, %203 : vector<16x32xf32>
    %206 = vector.broadcast %186 : vector<1x32xf32> to vector<16x32xf32>
    %207 = arith.addf %205, %206 : vector<16x32xf32>
    %c480 = arith.constant 480 : index
    %c0_65 = arith.constant 0 : index
    %208 = vector.load %arg1[%c480, %c0_65] : memref<736x128xbf16, #tpu.memory_space<vmem>>, vector<96x50xbf16>
    %c58 = arith.constant 58 : index
    %c0_66 = arith.constant 0 : index
    %209 = vector.load %arg0[%c58, %c0_66] : memref<64x128xf32, #tpu.memory_space<vmem>>, vector<1x50xf32>
    %210 = vector.extract_strided_slice %207 {offsets = [15, 0], sizes = [1, 32], strides = [1, 1]} : vector<16x32xf32> to vector<1x32xf32>
    %211 = vector.extract_strided_slice %207 {offsets = [0, 0], sizes = [15, 32], strides = [1, 1]} : vector<16x32xf32> to vector<15x32xf32>
    %212 = tpu.concatenate %210, %211 in 0 : vector<1x32xf32>, vector<15x32xf32> -> vector<16x32xf32>
    %213 = vector.broadcast %1 : vector<16x1xf32> to vector<16x32xf32>
    %214 = arith.mulf %212, %213 : vector<16x32xf32>
    %215 = vector.extract_strided_slice %207 {offsets = [1, 0], sizes = [15, 32], strides = [1, 1]} : vector<16x32xf32> to vector<15x32xf32>
    %216 = vector.extract_strided_slice %207 {offsets = [0, 0], sizes = [1, 32], strides = [1, 1]} : vector<16x32xf32> to vector<1x32xf32>
    %217 = tpu.concatenate %215, %216 in 0 : vector<15x32xf32>, vector<1x32xf32> -> vector<16x32xf32>
    %218 = vector.broadcast %2 : vector<16x1xf32> to vector<16x32xf32>
    %219 = arith.mulf %217, %218 : vector<16x32xf32>
    %220 = tpu.concatenate %214, %207, %219 in 1 : vector<16x32xf32>, vector<16x32xf32>, vector<16x32xf32> -> vector<16x96xf32>
    %221 = arith.truncf %220 : vector<16x96xf32> to vector<16x96xbf16>
    %cst_67 = arith.constant dense<0.000000e+00> : vector<16x50xf32>
    %222 = tpu.matmul %221, %208, %cst_67 {dimension_numbers = #tpu.dot_dimension_numbers<[1], [0], [0], [1], [0, 0, 1, 1], [], []>} : vector<16x96xbf16>, vector<96x50xbf16>, vector<16x50xf32> -> vector<16x50xf32>
    %223 = vector.broadcast %209 : vector<1x50xf32> to vector<16x50xf32>
    %224 = arith.addf %222, %223 : vector<16x50xf32>
    %cst_68 = arith.constant 0.000000e+00 : f32
    %225 = vector.broadcast %cst_68 : f32 to vector<16x50xf32>
    %226 = arith.maximumf %224, %225 : vector<16x50xf32>
    %c576 = arith.constant 576 : index
    %c0_69 = arith.constant 0 : index
    %227 = vector.load %arg1[%c576, %c0_69] : memref<736x128xbf16, #tpu.memory_space<vmem>>, vector<150x32xbf16>
    %c59 = arith.constant 59 : index
    %c0_70 = arith.constant 0 : index
    %228 = vector.load %arg0[%c59, %c0_70] : memref<64x128xf32, #tpu.memory_space<vmem>>, vector<1x32xf32>
    %229 = vector.extract_strided_slice %226 {offsets = [15, 0], sizes = [1, 50], strides = [1, 1]} : vector<16x50xf32> to vector<1x50xf32>
    %230 = vector.extract_strided_slice %226 {offsets = [0, 0], sizes = [15, 50], strides = [1, 1]} : vector<16x50xf32> to vector<15x50xf32>
    %231 = tpu.concatenate %229, %230 in 0 : vector<1x50xf32>, vector<15x50xf32> -> vector<16x50xf32>
    %232 = vector.broadcast %1 : vector<16x1xf32> to vector<16x50xf32>
    %233 = arith.mulf %231, %232 : vector<16x50xf32>
    %234 = vector.extract_strided_slice %226 {offsets = [1, 0], sizes = [15, 50], strides = [1, 1]} : vector<16x50xf32> to vector<15x50xf32>
    %235 = vector.extract_strided_slice %226 {offsets = [0, 0], sizes = [1, 50], strides = [1, 1]} : vector<16x50xf32> to vector<1x50xf32>
    %236 = tpu.concatenate %234, %235 in 0 : vector<15x50xf32>, vector<1x50xf32> -> vector<16x50xf32>
    %237 = vector.broadcast %2 : vector<16x1xf32> to vector<16x50xf32>
    %238 = arith.mulf %236, %237 : vector<16x50xf32>
    %239 = tpu.concatenate %233, %226, %238 in 1 : vector<16x50xf32>, vector<16x50xf32>, vector<16x50xf32> -> vector<16x150xf32>
    %240 = arith.truncf %239 : vector<16x150xf32> to vector<16x150xbf16>
    %cst_71 = arith.constant dense<0.000000e+00> : vector<16x32xf32>
    %241 = tpu.matmul %240, %227, %cst_71 {dimension_numbers = #tpu.dot_dimension_numbers<[1], [0], [0], [1], [0, 0, 1, 1], [], []>} : vector<16x150xbf16>, vector<150x32xbf16>, vector<16x32xf32> -> vector<16x32xf32>
    %242 = vector.broadcast %228 : vector<1x32xf32> to vector<16x32xf32>
    %243 = arith.addf %241, %242 : vector<16x32xf32>
    %cst_72 = arith.constant 0.000000e+00 : f32
    %244 = vector.broadcast %cst_72 : f32 to vector<16x32xf32>
    %245 = arith.maximumf %243, %244 : vector<16x32xf32>
    %246 = arith.addf %184, %245 : vector<16x32xf32>
    %c60 = arith.constant 60 : index
    %c0_73 = arith.constant 0 : index
    %247 = vector.load %arg0[%c60, %c0_73] : memref<64x128xf32, #tpu.memory_space<vmem>>, vector<1x32xf32>
    %c61 = arith.constant 61 : index
    %c0_74 = arith.constant 0 : index
    %248 = vector.load %arg0[%c61, %c0_74] : memref<64x128xf32, #tpu.memory_space<vmem>>, vector<1x32xf32>
    %cst_75 = arith.constant dense<0.000000e+00> : vector<16xf32>
    %249 = vector.multi_reduction <add>, %246, %cst_75 [1] : vector<16x32xf32> to vector<16xf32>
    %250 = vector.shape_cast %249 : vector<16xf32> to vector<16x1xf32>
    %cst_76 = arith.constant 3.200000e+01 : f32
    %251 = vector.broadcast %cst_76 : f32 to vector<16x1xf32>
    %252 = arith.divf %250, %251 : vector<16x1xf32>
    %253 = vector.broadcast %252 : vector<16x1xf32> to vector<16x32xf32>
    %254 = arith.subf %246, %253 : vector<16x32xf32>
    %255 = arith.mulf %254, %254 : vector<16x32xf32>
    %cst_77 = arith.constant dense<0.000000e+00> : vector<16xf32>
    %256 = vector.multi_reduction <add>, %255, %cst_77 [1] : vector<16x32xf32> to vector<16xf32>
    %257 = vector.shape_cast %256 : vector<16xf32> to vector<16x1xf32>
    %cst_78 = arith.constant 0.0322580636 : f32
    %258 = vector.broadcast %cst_78 : f32 to vector<16x1xf32>
    %259 = arith.mulf %257, %258 : vector<16x1xf32>
    %260 = math.sqrt %259 : vector<16x1xf32>
    %cst_79 = arith.constant 9.99999997E-7 : f32
    %261 = vector.broadcast %cst_79 : f32 to vector<16x1xf32>
    %262 = arith.addf %260, %261 : vector<16x1xf32>
    %263 = tpu.reciprocal %262 {approx = true} : vector<16x1xf32> -> vector<16x1xf32>
    %264 = vector.broadcast %263 : vector<16x1xf32> to vector<16x32xf32>
    %265 = arith.mulf %254, %264 : vector<16x32xf32>
    %266 = vector.broadcast %247 : vector<1x32xf32> to vector<16x32xf32>
    %267 = arith.mulf %266, %265 : vector<16x32xf32>
    %268 = vector.broadcast %248 : vector<1x32xf32> to vector<16x32xf32>
    %269 = arith.addf %267, %268 : vector<16x32xf32>
    %c0_80 = arith.constant 0 : index
    %c0_81 = arith.constant 0 : index
    %270 = vector.load %arg2[%c0_80, %c0_81] : memref<16x32xf32, #tpu.memory_space<vmem>>, vector<16x32xf32>
    tpu.vector_store %arg2[%c0_80, %c0_81], %269 {strides = array<i32>} : memref<16x32xf32, #tpu.memory_space<vmem>>, vector<16x32xf32>,
    return
  }
}

</mosaic_0001>

<bundles_post_ra>
// kernel: tpu_custom_call.1
= control target key start
LH: loop header
LB: loop body
LE: loop exit
PB: predicated region body
PF: predicated region fallthrough
CT: control target
= control target key end

     0   :  { %6 = vsyncpa [#allocation3], 0  ;;  %s115_s0 = inlined_call_operand.hbm [shape: f32[8,128], index: 0, kind: input, shape index: {}]   ;;  %s116_s1 = inlined_call_operand.hbm [shape: f32[8,128], index: 1, kind: output, shape index: {}]  }
   0x1   :  { %7 = vsyncpa [#allocation4], 0  ;;  %s13_s8 = sshll.u32 %s115_s0, 4  ;;  %s97_s9 = smov [#allocation2]   ;;  %s14_s8 = int_to_ptr.hbm [resolvable:$true] %s13_s8 }
   0x2   :  { %s15_s10 = sshll.u32 %s97_s9, 4  ;;  %s16_s10 = int_to_ptr.vmem [resolvable:$true] %s15_s10 }
   0x3   :  { %18 = dma.hbm_to_vmem [thread:$0]  %s14_s8, 128, %s16_s10, [#allocation3]  }
   0x4   :  { %93 = dma.done.wait [#allocation3], 128  }
   0x5   :  { %94 = vsyncadd [#allocation3], 4294967168  ;;  %s98_s11 = smov [#allocation5]   ;;  %s33_s15 = sshll.u32 %s116_s1, 4  ;;  %v23_v0 = vld [vmem:[#allocation2] sm:$0xff]  ;;  %s34_s15 = int_to_ptr.hbm [resolvable:$true] %s33_s15 }
   0x6   :  { %s31_s12 = sshll.u32 %s98_s11, 4  ;;  %v24_v1 = vrot.slane %v23_v0, 7  ;;  %s32_s12 = int_to_ptr.vmem [resolvable:$true] %s31_s12 }
   0x8   :  { %25 = vst [vmem:[#allocation5] sm:$0xff] %v24_v1 }
   0x9   :  { %36 = dma.vmem_to_hbm [thread:$0]  %s32_s12, 128, %s34_s15, [#allocation4]  }
   0xa   :  { %95 = dma.done.wait [#allocation4], 128  }
   0xb   :  { %96 = vsyncadd [#allocation4], 4294967168 }
   0xc   :  { %41 = vsyncpa [#allocation3], 1 }
   0xd   :  { %42 = vsyncpa [#allocation4], 1 }

// kernel: fn.1
= control target key start
LH: loop header
LB: loop body
LE: loop exit
PB: predicated region body
PF: predicated region fallthrough
CT: control target
= control target key end

     0   :  { %7 = vsyncpa [#allocation3], 0  ;;  %s2175_s0 = inlined_call_operand.vmem [shape: f32[64,128], index: 0, kind: input, shape index: {}]   ;;  %s2176_s1 = inlined_call_operand.hbm [shape: bf16[736,128], index: 1, kind: input, shape index: {}]   ;;  %s2177_s2 = inlined_call_operand.hbm [shape: f32[16,32], index: 2, kind: output, shape index: {}]  }
   0x1   :  { %8 = vsyncpa [#allocation4], 0  ;;  %s15_s11 = sshll.u32 %s2176_s1, 4  ;;  %s1856_s12 = smov [#allocation2]   ;;  %s16_s11 = int_to_ptr.hbm [resolvable:$true] %s15_s11 }
   0x2   :  { %s17_s13 = sshll.u32 %s1856_s12, 4  ;;  %s1857_s14 = smov 64   ;;  %s18_s13 = int_to_ptr.vmem [resolvable:$true] %s17_s13 }
   0x3   :  { %s1858_s15 = smov 4  }
   0x4   :  { %23 = dma.hbm_to_vmem [thread:$0]  %s16_s11, 5888, %s18_s13, [#allocation3], %s1857_s14, %s1857_s14, %s1858_s15  }
   0x5   :  { %1852 = dma.done.wait [#allocation3], 5888  }
   0x6   :  { %1853 = vsyncadd [#allocation3], 4294961408  ;;  %v1616_v0 = vld [vmem:[#allocation2 + $0x8] sm:$0xff]  ;;  %v1615_v1 = vld [vmem:[#allocation2] sm:$0xff]  ;;  %s1859_s19 = smov 96   ;;  %vm60_vm0 = vcmask 261120  }
   0x7   :  { %v1892_v2 = vld [vmem:[%s2175_s0] sm:$0xff]  ;;  %v1897_v3 = vld [vmem:[%s2175_s0 + $0x8] sm:$0xff]  ;;  %70 = vmatpush.bf16.msra.mxu0 %v1616_v0  ;;  %v1860_v13 = vmov 32.0   ;;  %v1618_v30 = vld [vmem:[#allocation2 + $0x18] sm:$0xff]  ;;  %vm453_vm10 = vcmask 1040384   ;;  %vm469_vm11 = vcmask 1046528  }
   0x8   :  { %54 = vrot.lane.b32.xlu0 %v1892_v2, %s1859_s19  ;;  %v39_v4 = vpack.c.bf16 %v1897_v3, %v1892_v2  ;;  %1730 = vrcp.f32 %v1860_v13  ;;  %v1620_v31 = vld [vmem:[#allocation2 + $0x28] sm:$0xff]  ;;  %169 = vmatpush.bf16.msra.mxu3 %v1618_v30  ;;  %v1617_v32 = vld [vmem:[#allocation2 + $0x10] sm:$0xff]  ;;  %v1619_v33 = vld [vmem:[#allocation2 + $0x20] sm:$0xff]  ;;  %s1863_s8 = smov 32   ;;  %vm503_vm12 = vcmask 523264   ;;  %vm544_vm13 = vcmask 785408  }
   0x9   :  { %199 = vmatpush.bf16.msra.mxu2 %v1620_v31  ;;  %v1716_v62 = vld [vmem:[%s2175_s0 + $0x30] ss:$0 sm:$0xff]  ;;  %v1953_v30 = vld [vmem:[%s2175_s0 + $0x20] sm:$0xff]  ;;  %vm688_vm14 = vcmask 1042432   ;;  %s1864_s11 = smov 50   ;;  %s1865_s12 = smov 100  }
   0xa   :  { %vm684_vm15 = vcmask 179200   ;;  %s1866_s30 = smov [#allocation5]   ;;  %s1405_s6 = sshll.u32 %s2177_s2, 4  ;;  %s1406_s6 = int_to_ptr.hbm [resolvable:$true] %s1405_s6 }
   0xb   :  { %71 = vmatpush.bf16.msra.mxu0 %v1615_v1  ;;  %s1403_s3 = sshll.u32 %s1866_s30, 4  ;;  %s1868_s7 = smov 8   ;;  %s1404_s3 = int_to_ptr.vmem [resolvable:$true] %s1403_s3 }
   0xc   :  { %170 = vmatpush.bf16.msra.mxu3 %v1617_v32 }
   0xd   :  { %200 = vmatpush.bf16.msra.mxu2 %v1619_v33 }
   0xe   :  { %1426 = vmatmul.msk.bf16.vlgmr.msra.gmra.mxu0 %vm60_vm0, %v39_v4  ;;  %v1731_v14 = vpop.eup %1730  ;;  %v1717_v4 = vld [vmem:[%s2175_s0 + $0x31] ss:$0 sm:$0xff] }
   0xf   :  { %v87_v15 = vmul.f32 32.0, %v1731_v14  ;;  %vm91_vm1 = vweird.f32 %v1731_v14 }
  0x10   :  { %56 = vrot.lane.b32.xlu0 %v1897_v3, %s1859_s19 }
  0x11   :  { %v88_v16 = vsub.f32 1.0, %v87_v15 }
  0x13   :  { %v89_v17 = vmul.f32 %v1731_v14, %v88_v16 }
  0x15   :  { %v90_v18 = vadd.f32 %v1731_v14, %v89_v17 }
  0x17   :  { %v1914_v19 = vsel %vm91_vm1, %v1731_v14, %v90_v18  ;;  %vm618_vm1 = vcmask 408576  }
  0x7a   :  { %v55_v5 = vpop.permute.xlu0 %54 }
  0x82   :  { %v57_v9 = vpop.permute.xlu0 %56 }
  0x8b   :  { %v73_v6 = vpop.f32.mrf.mxu0 }
  0x8c   :  { %v1906_v7 = vadd.f32 %v73_v6, %v55_v5 }
  0x8e   :  { %v80_v8 = vsel %vm60_vm0, %v1906_v7, 0.0 }
  0x8f   :  { %81 = vadd.xlane.f32.xlu1 %v80_v8 }
  0x93   :  { %v75_v10 = vpop.f32.mrf.mxu0 }
  0x94   :  { %v1910_v11 = vadd.f32 %v75_v10, %v57_v9 }
  0x96   :  { %v83_v12 = vsel %vm60_vm0, %v1910_v11, 0.0 }
  0x97   :  { %84 = vadd.xlane.f32.xlu1 %v83_v12 }
 0x102   :  { %v82_v20 = vpop.xlane.xlu1 %81 }
 0x103   :  { %v93_v21 = vmul.f32 %v1914_v19, %v82_v20 }
 0x105   :  { %v95_v22 = vsub.f32 %v1906_v7, %v93_v21 }
 0x107   :  { %v97_v23 = vmul.f32 %v95_v22, %v95_v22 }
 0x109   :  { %v99_v24 = vsel %vm60_vm0, %v97_v23, 0.0 }
 0x10a   :  { %100 = vadd.xlane.f32.xlu2 %v99_v24  ;;  %v85_v25 = vpop.xlane.xlu1 %84 }
 0x10b   :  { %v94_v26 = vmul.f32 %v1914_v19, %v85_v25 }
 0x10d   :  { %v96_v27 = vsub.f32 %v1910_v11, %v94_v26  ;;  %v1946_v26 = vld [vmem:[%s2175_s0 + $0x18] sm:$0xff] }
 0x10f   :  { %v98_v28 = vmul.f32 %v96_v27, %v96_v27 }
 0x111   :  { %v102_v29 = vsel %vm60_vm0, %v98_v28, 0.0 }
 0x112   :  { %103 = vadd.xlane.f32.xlu2 %v102_v29 }
 0x17d   :  { %v101_v34 = vpop.xlane.xlu2 %100 }
 0x17e   :  { %v105_v35 = vmul.f32 0.032258064, %v101_v34  ;;  %v1960_v34 = vld [vmem:[%s2175_s0 + $0x28] sm:$0xff] }
 0x180   :  { %1732 = vrsqrt.f32 %v105_v35  ;;  %vm114_vm2 = vcmp.eq.f32.partialorder %v105_v35, inf  ;;  %v117_v48 = vand.u32 2147483648, %v105_v35  ;;  %vm116_vm3 = vcmp.eq.f32.partialorder %v105_v35, 0.0 }
 0x185   :  { %v104_v36 = vpop.xlane.xlu2 %103 }
 0x186   :  { %v1733_v37 = vpop.eup %1732  ;;  %v106_v38 = vmul.f32 0.032258064, %v104_v36 }
 0x187   :  { %v108_v39 = vmul.f32 %v1733_v37, %v105_v35 }
 0x188   :  { %1734 = vrsqrt.f32 %v106_v38  ;;  %vm126_vm4 = vcmp.eq.f32.partialorder %v106_v38, inf  ;;  %v129_v56 = vand.u32 2147483648, %v106_v38  ;;  %vm128_vm5 = vcmp.eq.f32.partialorder %v106_v38, 0.0 }
 0x189   :  { %v109_v40 = vmul.f32 %v1733_v37, %v108_v39 }
 0x18b   :  { %v110_v41 = vmul.f32 0.5, %v109_v40 }
 0x18d   :  { %v111_v42 = vsub.f32 1.5, %v110_v41 }
 0x18e   :  { %v1735_v43 = vpop.eup %1734 }
 0x18f   :  { %v120_v44 = vmul.f32 %v1735_v43, %v106_v38  ;;  %v112_v45 = vmul.f32 %v1733_v37, %v111_v42 }
 0x191   :  { %v121_v46 = vmul.f32 %v1735_v43, %v120_v44  ;;  %v113_v47 = vmul.f32 %v112_v45, %v105_v35 }
 0x193   :  { %v122_v49 = vmul.f32 0.5, %v121_v46  ;;  %v115_v50 = vsel %vm114_vm2, %v105_v35, %v113_v47  ;;  %vm621_vm2 = vcmask 818176  }
 0x194   :  { %v118_v51 = vsel %vm116_vm3, %v117_v48, %v115_v50 }
 0x195   :  { %v123_v52 = vsub.f32 1.5, %v122_v49  ;;  %v131_v53 = vadd.f32 1e-06, %v118_v51 }
 0x197   :  { %v124_v54 = vmul.f32 %v1735_v43, %v123_v52  ;;  %1736 = vrcp.f32 %v131_v53 }
 0x199   :  { %v125_v55 = vmul.f32 %v124_v54, %v106_v38 }
 0x19b   :  { %v127_v57 = vsel %vm126_vm4, %v106_v38, %v125_v55 }
 0x19c   :  { %v130_v58 = vsel %vm128_vm5, %v129_v56, %v127_v57 }
 0x19d   :  { %v132_v59 = vadd.f32 1e-06, %v130_v58  ;;  %v1737_v60 = vpop.eup %1736 }
 0x19e   :  { %v135_v61 = vmul.f32 %v1737_v60, %v95_v22  ;;  %v1939_v22 = vld [vmem:[%s2175_s0 + $0x10] sm:$0xff] }
 0x19f   :  { %1738 = vrcp.f32 %v132_v59 }
 0x1a0   :  { %v138_v1 = vmul.f32 %v1716_v62, %v135_v61 }
 0x1a2   :  { %v141_v6 = vadd.f32 %v1717_v4, %v138_v1 }
 0x1a5   :  { %v1739_v63 = vpop.eup %1738 }
 0x1a6   :  { %v136_v0 = vmul.f32 %v1739_v63, %v96_v27 }
 0x1a8   :  { %v139_v5 = vmul.f32 %v1716_v62, %v136_v0 }
 0x1aa   :  { %v142_v8 = vadd.f32 %v1717_v4, %v139_v5 }
 0x1ac   :  { %v147_v9 = vpack.c.bf16 %v142_v8, %v141_v6 }
 0x1ae   :  { %1435 = vmatmul.msk.bf16.vlgmr.msra.gmra.mxu3 %vm60_vm0, %v147_v9  ;;  %1444 = vmatmul.msk.bf16.vlgmr.msra.gmra.mxu2 %vm60_vm0, %v147_v9 }
 0x231   :  { %v172_v10 = vpop.f32.mrf.mxu3  ;;  %v202_v12 = vpop.f32.mrf.mxu2 }
 0x239   :  { %v174_v13 = vpop.f32.mrf.mxu3  ;;  %v204_v14 = vpop.f32.mrf.mxu2 }
 0x23a   :  { %v207_v15 = vpack.c.bf16 %v174_v13, %v172_v10  ;;  %v208_v16 = vpack.c.bf16 %v204_v14, %v202_v12  ;;  %v1622_v14 = vld [vmem:[#allocation2 + $0x38] sm:$0xff] }
 0x23b   :  { %353 = vmatpush.bf16.msra.mxu1 %v1622_v14  ;;  %v1626_v14 = vld [vmem:[#allocation2 + $0x58] sm:$0xff] }
 0x23c   :  { %213 = vrot.lane.b32.xlu0 %v208_v16, %s1859_s19  ;;  %211 = vrot.lane.b32.xlu1 %v207_v15, %s1859_s19 }
 0x2ae   :  { %v214_v17 = vpop.permute.xlu0 %213  ;;  %v212_v20 = vpop.permute.xlu1 %211 }
 0x2af   :  { %v225_v18 = vsel %vm60_vm0, %v214_v17, 0  ;;  %v222_v21 = vsel %vm60_vm0, %v212_v20, 0 }
 0x2b0   :  { %233 = vmatpush.bf16.xpose.msrb.mxu3 %v225_v18 }
 0x2b8   :  { %234 = vmatpush.bf16.xpose.msrb.mxu3 %v222_v21 }
 0x2bf   :  { %1445 = vmatmul.msk.bf16.vlgmr.msrb.gmra.mxu3 %vm60_vm0, %v207_v15 }
 0x2cf   :  { %1446 = vmatmul.msk.bf16.gmra.mxu3 %vm60_vm0, %v208_v16 }
 0x342   :  { %v236_v23 = vpop.f32.mrf.mxu3 }
 0x343   :  { %v237_v24 = vadd.f32 %v236_v23, %v1939_v22 }
 0x345   :  { %v246_v25 = vsel %vm60_vm0, %v237_v24, -inf }
 0x346   :  { %247 = vmax.xlane.f32.xlu2 %v246_v25 }
 0x34a   :  { %v238_v27 = vpop.f32.mrf.mxu3 }
 0x34b   :  { %v239_v28 = vadd.f32 %v238_v27, %v1946_v26 }
 0x34d   :  { %v249_v29 = vsel %vm60_vm0, %v239_v28, -inf }
 0x34e   :  { %250 = vmax.xlane.f32.xlu0 %v249_v29 }
 0x352   :  { %v241_v31 = vpop.f32.mrf.mxu3 }
 0x353   :  { %v242_v32 = vadd.f32 %v241_v31, %v1953_v30 }
 0x355   :  { %v252_v33 = vsel %vm60_vm0, %v242_v32, -inf }
 0x356   :  { %253 = vmax.xlane.f32.xlu2 %v252_v33 }
 0x35a   :  { %v243_v35 = vpop.f32.mrf.mxu3 }
 0x35b   :  { %v244_v36 = vadd.f32 %v243_v35, %v1960_v34 }
 0x35d   :  { %v255_v37 = vsel %vm60_vm0, %v244_v36, -inf }
 0x35e   :  { %256 = vmax.xlane.f32.xlu2 %v255_v37 }
 0x362   :  { %292 = vrot.lane.b32.xlu0 %v207_v15, %s1857_s14  ;;  %v1621_v15 = vld [vmem:[#allocation2 + $0x30] sm:$0xff] }
 0x363   :  { %354 = vmatpush.bf16.msra.mxu1 %v1621_v15 }
 0x3b9   :  { %v248_v38 = vpop.xlane.xlu2 %247 }
 0x3ba   :  { %v258_v39 = vsub.f32 %v237_v24, %v248_v38 }
 0x3bc   :  { %v262_v40 = vmul.f32 1.442695, %v258_v39  ;;  %v1861_v39 = vmov 65  }
 0x3bd   :  { %1673 = vset.pattern.permute.xlu0 %v1861_v39  ;;  %1672 = vset.pattern.permute.xlu2 %v1861_v39 }
 0x3be   :  { %1740 = vpow2.f32 %v262_v40  ;;  %v1862_v40 = vmov 64  }
 0x3bf   :  { %1675 = vset.pattern.permute.xlu1 %v1862_v40 }
 0x3c1   :  { %v251_v41 = vpop.xlane.xlu0 %250 }
 0x3c2   :  { %v259_v42 = vsub.f32 %v239_v28, %v251_v41 }
 0x3c4   :  { %v1741_v43 = vpop.eup %1740  ;;  %v264_v44 = vmul.f32 1.442695, %v259_v42 }
 0x3c5   :  { %v270_v45 = vsel %vm60_vm0, %v1741_v43, 0.0 }
 0x3c6   :  { %1742 = vpow2.f32 %v264_v44  ;;  %271 = vadd.xlane.f32.xlu2 %v270_v45 }
 0x3c9   :  { %v254_v46 = vpop.xlane.xlu2 %253 }
 0x3ca   :  { %v260_v54 = vsub.f32 %v242_v32, %v254_v46 }
 0x3cc   :  { %v1743_v47 = vpop.eup %1742  ;;  %v266_v55 = vmul.f32 1.442695, %v260_v54 }
 0x3cd   :  { %v273_v48 = vsel %vm60_vm0, %v1743_v47, 0.0 }
 0x3ce   :  { %274 = vadd.xlane.f32.xlu1 %v273_v48 }
 0x3d1   :  { %v257_v49 = vpop.xlane.xlu2 %256 }
 0x3d2   :  { %v261_v50 = vsub.f32 %v244_v36, %v257_v49 }
 0x3d4   :  { %v268_v51 = vmul.f32 1.442695, %v261_v50  ;;  %v293_v61 = vpop.permute.xlu0 %292 }
 0x3d6   :  { %1744 = vpow2.f32 %v268_v51 }
 0x3d7   :  { %1746 = vpow2.f32 %v266_v55 }
 0x3dc   :  { %v1745_v52 = vpop.eup %1744 }
 0x3dd   :  { %v279_v53 = vsel %vm60_vm0, %v1745_v52, 0.0  ;;  %v1747_v56 = vpop.eup %1746 }
 0x3de   :  { %294 = vrot.lane.b32.xlu2 %v208_v16, %s1857_s14  ;;  %280 = vadd.xlane.f32.xlu1 %v279_v53  ;;  %v276_v57 = vsel %vm60_vm0, %v1747_v56, 0.0 }
 0x407   :  { %277 = vadd.xlane.f32.xlu2 %v276_v57 }
 0x439   :  { %v272_v58 = vpop.xlane.xlu2 %271 }
 0x43a   :  { %1748 = vrcp.f32 %v272_v58 }
 0x440   :  { %v1749_v62 = vpop.eup %1748 }
 0x441   :  { %v275_v59 = vpop.xlane.xlu1 %274  ;;  %v295_v60 = vpop.permute.xlu2 %294  ;;  %v286_v0 = vmul.f32 %v1749_v62, %v1741_v43 }
 0x442   :  { %1750 = vrcp.f32 %v275_v59  ;;  %310 = vmatpush.bf16.msrb.mxu0 %v295_v60 }
 0x446   :  { %311 = vmatpush.bf16.msrb.mxu0 %v293_v61 }
 0x448   :  { %v1751_v63 = vpop.eup %1750 }
 0x449   :  { %v287_v1 = vmul.f32 %v1751_v63, %v1743_v47 }
 0x44b   :  { %v290_v4 = vpack.c.bf16 %v287_v1, %v286_v0 }
 0x44d   :  { %1447 = vmatmul.msk.bf16.vlgmr.msrb.gmra.mxu0 %vm60_vm0, %v290_v4 }
 0x451   :  { %v281_v5 = vpop.xlane.xlu1 %280 }
 0x452   :  { %1752 = vrcp.f32 %v281_v5  ;;  %v1628_v5 = vld [vmem:[#allocation2 + $0x68] sm:$0xff] }
 0x453   :  { %550 = vmatpush.bf16.msrb.mxu2 %v1628_v5  ;;  %v1720_v5 = vld [vmem:[%s2175_s0 + $0x34] ss:$0 sm:$0xff] }
 0x458   :  { %v1753_v8 = vpop.eup %1752 }
 0x459   :  { %v289_v12 = vmul.f32 %v1753_v8, %v1745_v52  ;;  %v1627_v8 = vld [vmem:[#allocation2 + $0x60] sm:$0xff] }
 0x45a   :  { %551 = vmatpush.bf16.msrb.mxu2 %v1627_v8 }
 0x45e   :  { %552 = vmatpush.bf16.msrb.mxu2 %v1626_v14 }
 0x47a   :  { %v278_v6 = vpop.xlane.xlu2 %277 }
 0x47b   :  { %1754 = vrcp.f32 %v278_v6 }
 0x481   :  { %v1755_v9 = vpop.eup %1754 }
 0x482   :  { %v288_v10 = vmul.f32 %v1755_v9, %v1747_v56 }
 0x484   :  { %v291_v13 = vpack.c.bf16 %v289_v12, %v288_v10 }
 0x486   :  { %1448 = vmatmul.msk.bf16.gmra.mxu0 %vm60_vm0, %v291_v13 }
 0x4ca   :  { %v313_v16 = vpop.f32.mrf.mxu0 }
 0x4d2   :  { %v315_v17 = vpop.f32.mrf.mxu0 }
 0x4d3   :  { %v327_v18 = vpack.c.bf16 %v315_v17, %v313_v16  ;;  %v1718_v17 = vld [vmem:[%s2175_s0 + $0x32] ss:$0 sm:$0xff] }
 0x4d5   :  { %1457 = vmatmul.msk.bf16.vlgmr.msra.gmra.mxu1 %vm60_vm0, %v327_v18 }
 0x503   :  { %v318_v20 = vpop.f32.mrf.mxu0 }
 0x50b   :  { %v320_v21 = vpop.f32.mrf.mxu0 }
 0x50c   :  { %v328_v23 = vpack.c.bf16 %v320_v21, %v318_v20  ;;  %v1719_v20 = vld [vmem:[%s2175_s0 + $0x33] ss:$0 sm:$0xff] }
 0x50e   :  { %1458 = vmatmul.msk.bf16.gmra.mxu1 %vm60_vm0, %v328_v23 }
 0x552   :  { %v356_v24 = vpop.f32.mrf.mxu1 }
 0x553   :  { %v366_v29 = vadd.f32 %v356_v24, %v1906_v7 }
 0x55a   :  { %v358_v25 = vpop.f32.mrf.mxu1 }
 0x55b   :  { %v367_v35 = vadd.f32 %v358_v25, %v1910_v11 }
 0x58b   :  { %v361_v27 = vpop.f32.mrf.mxu1 }
 0x58c   :  { %370 = vrot.lane.b32.xlu0 %v361_v27, %s1859_s19 }
 0x593   :  { %v363_v28 = vpop.f32.mrf.mxu1 }
 0x594   :  { %372 = vrot.lane.b32.xlu1 %v363_v28, %s1859_s19 }
 0x5fe   :  { %v371_v31 = vpop.permute.xlu0 %370 }
 0x5ff   :  { %v1977_v32 = vadd.f32 %v371_v31, %v366_v29 }
 0x601   :  { %v380_v33 = vsel %vm60_vm0, %v1977_v32, 0.0 }
 0x602   :  { %381 = vadd.xlane.f32.xlu0 %v380_v33 }
 0x606   :  { %v373_v36 = vpop.permute.xlu1 %372 }
 0x607   :  { %v1982_v37 = vadd.f32 %v373_v36, %v367_v35 }
 0x609   :  { %v383_v38 = vsel %vm60_vm0, %v1982_v37, 0.0 }
 0x60a   :  { %384 = vadd.xlane.f32.xlu2 %v383_v38 }
 0x616   :  { %482 = vperm.xlu0 %1673, %v1897_v3  }
 0x675   :  { %v382_v7 = vpop.xlane.xlu0 %381 }
 0x676   :  { %v386_v41 = vmul.f32 %v382_v7, %v1914_v19 }
 0x678   :  { %v388_v42 = vsub.f32 %v1977_v32, %v386_v41 }
 0x67a   :  { %v390_v11 = vmul.f32 %v388_v42, %v388_v42 }
 0x67c   :  { %v392_v43 = vsel %vm60_vm0, %v390_v11, 0.0 }
 0x67d   :  { %393 = vadd.xlane.f32.xlu1 %v392_v43  ;;  %v385_v44 = vpop.xlane.xlu2 %384 }
 0x67e   :  { %v387_v45 = vmul.f32 %v385_v44, %v1914_v19 }
 0x680   :  { %v389_v46 = vsub.f32 %v1982_v37, %v387_v45  ;;  %v1625_v45 = vld [vmem:[#allocation2 + $0x50] sm:$0xff] }
 0x681   :  { %553 = vmatpush.bf16.msrb.mxu2 %v1625_v45 }
 0x682   :  { %v391_v47 = vmul.f32 %v389_v46, %v389_v46 }
 0x684   :  { %v395_v48 = vsel %vm60_vm0, %v391_v47, 0.0  ;;  %v1623_v47 = vld [vmem:[#allocation2 + $0x40] sm:$0xff] }
 0x685   :  { %396 = vadd.xlane.f32.xlu2 %v395_v48 }
 0x688   :  { %v2002_v38 = vpop.permute.xlu0 %482 }
 0x696   :  { %464 = vperm.xlu1 %1675, %v1897_v3  }
 0x69d   :  { %478 = vperm.xlu2 %1672, %v1892_v2  }
 0x6a5   :  { %1674 = vset.pattern.permute.xlu2 %v1862_v40 }
 0x6a6   :  { %460 = vperm.xlu2 %1674, %v1892_v2  }
 0x6f0   :  { %v394_v49 = vpop.xlane.xlu1 %393 }
 0x6f1   :  { %v398_v50 = vmul.f32 0.032258064, %v394_v49 }
 0x6f3   :  { %1756 = vrsqrt.f32 %v398_v50  ;;  %vm407_vm6 = vcmp.eq.f32.partialorder %v398_v50, inf  ;;  %v410_v62 = vand.u32 2147483648, %v398_v50  ;;  %vm409_vm7 = vcmp.eq.f32.partialorder %v398_v50, 0.0 }
 0x6f8   :  { %v397_v51 = vpop.xlane.xlu2 %396 }
 0x6f9   :  { %v1757_v52 = vpop.eup %1756  ;;  %v399_v53 = vmul.f32 0.032258064, %v397_v51 }
 0x6fa   :  { %v401_v54 = vmul.f32 %v1757_v52, %v398_v50 }
 0x6fb   :  { %1758 = vrsqrt.f32 %v399_v53  ;;  %vm419_vm8 = vcmp.eq.f32.partialorder %v399_v53, inf  ;;  %v422_v10 = vand.u32 2147483648, %v399_v53  ;;  %vm421_vm9 = vcmp.eq.f32.partialorder %v399_v53, 0.0 }
 0x6fc   :  { %v402_v55 = vmul.f32 %v1757_v52, %v401_v54 }
 0x6fe   :  { %v403_v56 = vmul.f32 0.5, %v402_v55 }
 0x700   :  { %v404_v57 = vsub.f32 1.5, %v403_v56 }
 0x701   :  { %v1759_v58 = vpop.eup %1758 }
 0x702   :  { %v405_v59 = vmul.f32 %v1757_v52, %v404_v57  ;;  %v413_v60 = vmul.f32 %v1759_v58, %v399_v53 }
 0x704   :  { %v406_v3 = vmul.f32 %v405_v59, %v398_v50  ;;  %v414_v61 = vmul.f32 %v1759_v58, %v413_v60 }
 0x706   :  { %v408_v63 = vsel %vm407_vm6, %v398_v50, %v406_v3  ;;  %v415_v2 = vmul.f32 0.5, %v414_v61 }
 0x707   :  { %v411_v0 = vsel %vm409_vm7, %v410_v62, %v408_v63  ;;  %v1636_v62 = vld [vmem:[#allocation2 + $0xa8] sm:$0xff]  ;;  %v582_v63 = vld [vmem:[#allocation2 + $0xb8] sm:$0x7] }
 0x708   :  { %v416_v1 = vsub.f32 1.5, %v415_v2  ;;  %v424_v4 = vadd.f32 1e-06, %v411_v0  ;;  %v2016_v50 = vpop.permute.xlu1 %464  ;;  %v664_v2 = vunpack.c.l.b16 %v582_v63  ;;  %692 = vmatpush.bf16.msra.mxu3 %v1636_v62  ;;  %v1635_v0 = vld [vmem:[#allocation2 + $0xa0] sm:$0xff] }
 0x70a   :  { %v417_v6 = vmul.f32 %v1759_v58, %v416_v1  ;;  %1760 = vrcp.f32 %v424_v4  ;;  %v674_v1 = vpack.c.b16 %v664_v2, %v664_v2 }
 0x70c   :  { %v418_v9 = vmul.f32 %v417_v6, %v399_v53  ;;  %v690_v4 = vsel %vm688_vm14, %v674_v1, 0  ;;  %693 = vmatpush.bf16.msra.mxu3 %v1635_v0 }
 0x70e   :  { %v420_v12 = vsel %vm419_vm8, %v399_v53, %v418_v9 }
 0x70f   :  { %v423_v13 = vsel %vm421_vm9, %v422_v10, %v420_v12 }
 0x710   :  { %v1761_v15 = vpop.eup %1760  ;;  %v425_v16 = vadd.f32 1e-06, %v423_v13 }
 0x711   :  { %v428_v18 = vmul.f32 %v1761_v15, %v388_v42  ;;  %v2009_v42 = vpop.permute.xlu2 %478 }
 0x712   :  { %1762 = vrcp.f32 %v425_v16 }
 0x713   :  { %v431_v21 = vmul.f32 %v1718_v17, %v428_v18 }
 0x715   :  { %v434_v25 = vadd.f32 %v1719_v20, %v431_v21 }
 0x717   :  { %v454_v29 = vrot.slane %v434_v25, 7  ;;  %v470_v35 = vrot.slane %v434_v25, 1 }
 0x718   :  { %v1763_v23 = vpop.eup %1762 }
 0x719   :  { %v429_v24 = vmul.f32 %v1763_v23, %v389_v46  ;;  %v1624_v46 = vld [vmem:[#allocation2 + $0x48] sm:$0xff]  ;;  %v2014_v48 = vpop.permute.xlu2 %460 }
 0x71a   :  { %554 = vmatpush.bf16.msrb.mxu2 %v1624_v46 }
 0x71b   :  { %v432_v27 = vmul.f32 %v1718_v17, %v429_v24 }
 0x71d   :  { %v435_v28 = vadd.f32 %v1719_v20, %v432_v27 }
 0x71e   :  { %555 = vmatpush.bf16.msrb.mxu2 %v1623_v47 }
 0x71f   :  { %v450_v31 = vrot.slane %v435_v28, 7  ;;  %v1676_v33 = vpack.i.bf16 %v435_v28, %v434_v25  ;;  %v471_v36 = vrot.slane %v435_v28, 1 }
 0x721   :  { %v458_v39 = vsel %vm453_vm10, %v450_v31, %v454_v29  ;;  %1677 = vrot.lane.b32.xlu2 %v1676_v33, %s1863_s8  ;;  %v455_v40 = vsel %vm453_vm10, %v454_v29, %v450_v31  ;;  %v472_v7 = vsel %vm469_vm11, %v470_v35, %v471_v36  ;;  %v476_v41 = vsel %vm469_vm11, %v471_v36, %v470_v35  ;;  %v1637_v29 = vld [vmem:[#allocation2 + $0xb0] sm:$0xff]  ;;  %v1634_v31 = vld [vmem:[#allocation2 + $0x98] sm:$0xff]  ;;  %v1632_v35 = vld [vmem:[#allocation2 + $0x88] sm:$0xff] }
 0x722   :  { %v485_v11 = vmul.f32 %v2009_v42, %v472_v7  ;;  %v486_v43 = vmul.f32 %v2002_v38, %v476_v41  ;;  %v467_v53 = vmul.f32 %v2014_v48, %v458_v39  ;;  %v468_v54 = vmul.f32 %v2016_v50, %v455_v40  ;;  %712 = vmatpush.bf16.msra.mxu2 %v690_v4  ;;  %v1633_v33 = vld [vmem:[#allocation2 + $0x90] sm:$0xff]  ;;  %v1631_v36 = vld [vmem:[#allocation2 + $0x80] sm:$0xff]  ;;  %v1630_v39 = vld [vmem:[#allocation2 + $0x78] sm:$0xff] }
 0x723   :  { %694 = vmatpush.bf16.msra.mxu3 %v1634_v31  ;;  %v1629_v40 = vld [vmem:[#allocation2 + $0x70] sm:$0xff] }
 0x724   :  { %v1681_v44 = vpack.i.bf16 %v486_v43, %v485_v11 }
 0x726   :  { %713 = vmatpush.bf16.msra.mxu2 %v1637_v29 }
 0x727   :  { %695 = vmatpush.bf16.msra.mxu3 %v1633_v33 }
 0x729   :  { %1682 = vrot.lane.b32.xlu2 %v1681_v44, %s1857_s14 }
 0x72b   :  { %696 = vmatpush.bf16.msra.mxu3 %v1632_v35 }
 0x72f   :  { %697 = vmatpush.bf16.msra.mxu3 %v1631_v36 }
 0x733   :  { %698 = vmatpush.bf16.msra.mxu3 %v1630_v39 }
 0x737   :  { %699 = vmatpush.bf16.msra.mxu3 %v1629_v40 }
 0x77b   :  { %v1678_v49 = vpop.permute.xlu2 %1677 }
 0x77c   :  { %v1680_v51 = vunpack.i.h.bf16 %v1678_v49  ;;  %v1679_v52 = vunpack.i.l.bf16 %v1678_v49 }
 0x77e   :  { %v501_v58 = vsel %vm60_vm0, %v467_v53, %v1679_v52  ;;  %v502_v59 = vsel %vm60_vm0, %v468_v54, %v1680_v51 }
 0x783   :  { %v1683_v55 = vpop.permute.xlu2 %1682 }
 0x784   :  { %v1685_v56 = vunpack.i.h.bf16 %v1683_v55  ;;  %v1684_v57 = vunpack.i.l.bf16 %v1683_v55 }
 0x786   :  { %v504_v60 = vsel %vm503_vm12, %v501_v58, %v1684_v57  ;;  %v505_v3 = vsel %vm503_vm12, %v502_v59, %v1685_v56  ;;  %v1721_v56 = vld [vmem:[%s2175_s0 + $0x35] ss:$0 sm:$0xff] }
 0x787   :  { %v506_v61 = vpack.c.bf16 %v505_v3, %v504_v60 }
 0x789   :  { %1483 = vmatmul.msk.bf16.vlgmr.msrb.gmra.mxu2 %vm544_vm13, %v506_v61 }
 0x80c   :  { %v557_v6 = vpop.f32.mrf.mxu2 }
 0x80d   :  { %v558_v8 = vadd.f32 %v1720_v5, %v557_v6 }
 0x80f   :  { %v562_v9 = vmax.f32 %v558_v8, 0.0 }
 0x811   :  { %v588_v14 = vrot.slane %v562_v9, 7  ;;  %v595_v15 = vrot.slane %v562_v9, 1 }
 0x814   :  { %v559_v10 = vpop.f32.mrf.mxu2 }
 0x815   :  { %v560_v12 = vadd.f32 %v1720_v5, %v559_v10 }
 0x817   :  { %v563_v13 = vmax.f32 %v560_v12, 0.0 }
 0x819   :  { %v585_v16 = vrot.slane %v563_v13, 7  ;;  %v596_v17 = vrot.slane %v563_v13, 1  ;;  %v1686_v18 = vpack.i.bf16 %v563_v13, %v562_v9 }
 0x81b   :  { %v589_v20 = vsel %vm453_vm10, %v588_v14, %v585_v16  ;;  %v592_v21 = vsel %vm453_vm10, %v585_v16, %v588_v14  ;;  %1687 = vrot.lane.b32.xlu0 %v1686_v18, %s1864_s11  ;;  %v597_v23 = vsel %vm469_vm11, %v595_v15, %v596_v17  ;;  %v601_v24 = vsel %vm469_vm11, %v596_v17, %v595_v15  ;;  %v1641_v17 = vld [vmem:[#allocation2 + $0xd8] sm:$0xff]  ;;  %v1639_v18 = vld [vmem:[#allocation2 + $0xc8] sm:$0xff] }
 0x81c   :  { %v602_v25 = vmul.f32 %v597_v23, %v2009_v42  ;;  %v603_v27 = vmul.f32 %v601_v24, %v2002_v38  ;;  %v593_v45 = vmul.f32 %v592_v21, %v2014_v48  ;;  %v594_v49 = vmul.f32 %v589_v20, %v2016_v50  ;;  %838 = vmatpush.bf16.msrb.mxu1 %v1641_v17  ;;  %v1640_v21 = vld [vmem:[#allocation2 + $0xd0] sm:$0xff]  ;;  %v1638_v23 = vld [vmem:[#allocation2 + $0xc0] sm:$0xff] }
 0x81d   :  { %808 = vmatpush.bf16.msra.mxu0 %v1639_v18 }
 0x81e   :  { %v1691_v28 = vpack.i.bf16 %v603_v27, %v602_v25 }
 0x820   :  { %1692 = vrot.lane.b32.xlu2 %v1691_v28, %s1865_s12  ;;  %839 = vmatpush.bf16.msrb.mxu1 %v1640_v21 }
 0x821   :  { %809 = vmatpush.bf16.msra.mxu0 %v1638_v23 }
 0x87a   :  { %v1693_v7 = vpop.permute.xlu2 %1692 }
 0x87b   :  { %v1695_v41 = vunpack.i.h.bf16 %v1693_v7  ;;  %v1694_v11 = vunpack.i.l.bf16 %v1693_v7 }
 0x87d   :  { %v625_v43 = vpack.c.bf16 %v1695_v41, %v1694_v11 }
 0x87f   :  { %1520 = vmatmul.msk.bf16.vlgmr.msra.gmra.mxu2 %vm684_vm15, %v625_v43 }
 0x88d   :  { %v1688_v44 = vpop.permute.xlu0 %1687 }
 0x88e   :  { %v1690_v46 = vunpack.i.h.bf16 %v1688_v44  ;;  %v1689_v47 = vunpack.i.l.bf16 %v1688_v44 }
 0x890   :  { %v619_v51 = vsel %vm618_vm1, %v593_v45, %v1689_v47  ;;  %v620_v52 = vsel %vm618_vm1, %v594_v49, %v1690_v46 }
 0x891   :  { %v622_v53 = vsel %vm621_vm2, %v619_v51, %v1694_v11  ;;  %v623_v54 = vsel %vm621_vm2, %v620_v52, %v1695_v41 }
 0x892   :  { %v624_v55 = vpack.c.bf16 %v623_v54, %v622_v53 }
 0x894   :  { %700 = vmatmul.bf16.vlgmr.msra.gmra.mxu3 %v624_v55 }
 0x902   :  { %v715_v57 = vpop.f32.mrf.mxu2 }
 0x90a   :  { %v717_v0 = vpop.f32.mrf.mxu2 }
 0x917   :  { %v701_v58 = vpop.f32.mrf.mxu3 }
 0x918   :  { %v702_v59 = vadd.f32 %v1721_v56, %v701_v58  ;;  %v1722_v58 = vld [vmem:[%s2175_s0 + $0x36] ss:$0 sm:$0xff] }
 0x91a   :  { %v716_v60 = vadd.f32 %v715_v57, %v702_v59 }
 0x91c   :  { %v720_v3 = vmax.f32 %v716_v60, 0.0 }
 0x91e   :  { %v2048_v61 = vadd.f32 %v720_v3, %v1977_v32 }
 0x91f   :  { %v703_v62 = vpop.f32.mrf.mxu3 }
 0x920   :  { %v704_v63 = vadd.f32 %v1721_v56, %v703_v62  ;;  %v726_v2 = vsel %vm60_vm0, %v2048_v61, 0.0  ;;  %v1723_v62 = vld [vmem:[%s2175_s0 + $0x37] ss:$0 sm:$0xff] }
 0x921   :  { %727 = vadd.xlane.f32.xlu1 %v726_v2 }
 0x922   :  { %v718_v1 = vadd.f32 %v717_v0, %v704_v63 }
 0x924   :  { %v721_v4 = vmax.f32 %v718_v1, 0.0 }
 0x926   :  { %v2053_v5 = vadd.f32 %v721_v4, %v1982_v37 }
 0x928   :  { %v729_v6 = vsel %vm60_vm0, %v2053_v5, 0.0 }
 0x929   :  { %730 = vadd.xlane.f32.xlu0 %v729_v6 }
 0x994   :  { %v728_v8 = vpop.xlane.xlu1 %727 }
 0x995   :  { %v732_v32 = vmul.f32 %v728_v8, %v1914_v19 }
 0x997   :  { %v734_v9 = vsub.f32 %v2048_v61, %v732_v32 }
 0x999   :  { %v736_v10 = vmul.f32 %v734_v9, %v734_v9 }
 0x99b   :  { %v738_v12 = vsel %vm60_vm0, %v736_v10, 0.0 }
 0x99c   :  { %v731_v13 = vpop.xlane.xlu0 %730  ;;  %739 = vadd.xlane.f32.xlu2 %v738_v12 }
 0x99d   :  { %v733_v14 = vmul.f32 %v731_v13, %v1914_v19 }
 0x99f   :  { %v735_v15 = vsub.f32 %v2053_v5, %v733_v14 }
 0x9a1   :  { %v737_v37 = vmul.f32 %v735_v15, %v735_v15 }
 0x9a3   :  { %v741_v16 = vsel %vm60_vm0, %v737_v37, 0.0 }
 0x9a4   :  { %742 = vadd.xlane.f32.xlu1 %v741_v16 }
 0xa0f   :  { %v740_v20 = vpop.xlane.xlu2 %739 }
 0xa10   :  { %v744_v24 = vmul.f32 0.032258064, %v740_v20 }
 0xa12   :  { %1764 = vrsqrt.f32 %v744_v24  ;;  %vm753_vm3 = vcmp.eq.f32.partialorder %v744_v24, inf  ;;  %v756_v11 = vand.u32 2147483648, %v744_v24  ;;  %vm755_vm4 = vcmp.eq.f32.partialorder %v744_v24, 0.0 }
 0xa17   :  { %v743_v25 = vpop.xlane.xlu1 %742 }
 0xa18   :  { %v1765_v27 = vpop.eup %1764  ;;  %v745_v28 = vmul.f32 0.032258064, %v743_v25 }
 0xa19   :  { %v747_v29 = vmul.f32 %v1765_v27, %v744_v24 }
 0xa1a   :  { %1766 = vrsqrt.f32 %v745_v28  ;;  %vm765_vm5 = vcmp.eq.f32.partialorder %v745_v28, inf  ;;  %v768_v52 = vand.u32 2147483648, %v745_v28  ;;  %vm767_vm6 = vcmp.eq.f32.partialorder %v745_v28, 0.0 }
 0xa1b   :  { %v748_v31 = vmul.f32 %v1765_v27, %v747_v29 }
 0xa1d   :  { %v749_v33 = vmul.f32 0.5, %v748_v31 }
 0xa1f   :  { %v750_v35 = vsub.f32 1.5, %v749_v33 }
 0xa20   :  { %v1767_v36 = vpop.eup %1766 }
 0xa21   :  { %v751_v39 = vmul.f32 %v1765_v27, %v750_v35  ;;  %v759_v40 = vmul.f32 %v1767_v36, %v745_v28 }
 0xa23   :  { %v752_v7 = vmul.f32 %v751_v39, %v744_v24  ;;  %v760_v41 = vmul.f32 %v1767_v36, %v759_v40 }
 0xa25   :  { %v754_v43 = vsel %vm753_vm3, %v744_v24, %v752_v7  ;;  %v761_v44 = vmul.f32 0.5, %v760_v41 }
 0xa26   :  { %v757_v45 = vsel %vm755_vm4, %v756_v11, %v754_v43 }
 0xa27   :  { %v762_v46 = vsub.f32 1.5, %v761_v44  ;;  %v770_v47 = vadd.f32 1e-06, %v757_v45 }
 0xa29   :  { %v763_v49 = vmul.f32 %v1767_v36, %v762_v46  ;;  %1768 = vrcp.f32 %v770_v47 }
 0xa2b   :  { %v764_v51 = vmul.f32 %v763_v49, %v745_v28 }
 0xa2d   :  { %v766_v53 = vsel %vm765_vm5, %v745_v28, %v764_v51 }
 0xa2e   :  { %v769_v54 = vsel %vm767_vm6, %v768_v52, %v766_v53 }
 0xa2f   :  { %v771_v55 = vadd.f32 1e-06, %v769_v54  ;;  %v1769_v56 = vpop.eup %1768 }
 0xa30   :  { %v774_v57 = vmul.f32 %v1769_v56, %v734_v9 }
 0xa31   :  { %1770 = vrcp.f32 %v771_v55 }
 0xa32   :  { %v777_v3 = vmul.f32 %v1722_v58, %v774_v57 }
 0xa34   :  { %v780_v2 = vadd.f32 %v1723_v62, %v777_v3 }
 0xa37   :  { %v1771_v59 = vpop.eup %1770 }
 0xa38   :  { %v775_v60 = vmul.f32 %v1771_v59, %v735_v15 }
 0xa3a   :  { %v778_v63 = vmul.f32 %v1722_v58, %v775_v60 }
 0xa3c   :  { %v781_v0 = vadd.f32 %v1723_v62, %v778_v63 }
 0xa3e   :  { %v786_v1 = vpack.c.bf16 %v781_v0, %v780_v2 }
 0xa40   :  { %1529 = vmatmul.msk.bf16.vlgmr.msra.gmra.mxu0 %vm60_vm0, %v786_v1  ;;  %1538 = vmatmul.msk.bf16.vlgmr.msrb.gmra.mxu1 %vm60_vm0, %v786_v1 }
 0xabd   :  { %v811_v4 = vpop.f32.mrf.mxu0  ;;  %v841_v6 = vpop.f32.mrf.mxu1 }
 0xac5   :  { %v813_v8 = vpop.f32.mrf.mxu0  ;;  %v843_v32 = vpop.f32.mrf.mxu1 }
 0xac6   :  { %v846_v9 = vpack.c.bf16 %v813_v8, %v811_v4  ;;  %v847_v10 = vpack.c.bf16 %v843_v32, %v841_v6  ;;  %v1643_v6 = vld [vmem:[#allocation2 + $0xe8] sm:$0xff]  ;;  %v1642_v8 = vld [vmem:[#allocation2 + $0xe0] sm:$0xff] }
 0xac7   :  { %992 = vmatpush.bf16.msrb.mxu0 %v1643_v6 }
 0xac8   :  { %852 = vrot.lane.b32.xlu0 %v847_v10, %s1859_s19  ;;  %850 = vrot.lane.b32.xlu2 %v846_v9, %s1859_s19 }
 0xacb   :  { %993 = vmatpush.bf16.msrb.mxu0 %v1642_v8  ;;  %v1646_v8 = vld [vmem:[#allocation2 + $0x100] sm:$0xff] }
 0xb22   :  { %v851_v14 = vpop.permute.xlu2 %850 }
 0xb23   :  { %v861_v15 = vsel %vm60_vm0, %v851_v14, 0 }
 0xb3a   :  { %v853_v12 = vpop.permute.xlu0 %852 }
 0xb3b   :  { %v864_v13 = vsel %vm60_vm0, %v853_v12, 0 }
 0xb3c   :  { %872 = vmatpush.bf16.xpose.msrb.mxu2 %v864_v13 }
 0xb44   :  { %873 = vmatpush.bf16.xpose.msrb.mxu2 %v861_v15 }
 0xb4b   :  { %1539 = vmatmul.msk.bf16.vlgmr.msrb.gmra.mxu2 %vm60_vm0, %v846_v9 }
 0xb5b   :  { %1540 = vmatmul.msk.bf16.gmra.mxu2 %vm60_vm0, %v847_v10 }
 0xbce   :  { %v875_v37 = vpop.f32.mrf.mxu2 }
 0xbcf   :  { %v876_v16 = vadd.f32 %v875_v37, %v1939_v22 }
 0xbd1   :  { %v885_v17 = vsel %vm60_vm0, %v876_v16, -inf }
 0xbd2   :  { %886 = vmax.xlane.f32.xlu1 %v885_v17 }
 0xbd6   :  { %v877_v18 = vpop.f32.mrf.mxu2 }
 0xbd7   :  { %v878_v20 = vadd.f32 %v877_v18, %v1946_v26 }
 0xbd9   :  { %v888_v21 = vsel %vm60_vm0, %v878_v20, -inf }
 0xbda   :  { %889 = vmax.xlane.f32.xlu1 %v888_v21 }
 0xbde   :  { %v880_v23 = vpop.f32.mrf.mxu2 }
 0xbdf   :  { %v881_v24 = vadd.f32 %v880_v23, %v1953_v30 }
 0xbe1   :  { %v891_v25 = vsel %vm60_vm0, %v881_v24, -inf }
 0xbe2   :  { %892 = vmax.xlane.f32.xlu0 %v891_v25 }
 0xbe6   :  { %v882_v27 = vpop.f32.mrf.mxu2 }
 0xbe7   :  { %v883_v28 = vadd.f32 %v882_v27, %v1960_v34 }
 0xbe9   :  { %v894_v22 = vsel %vm60_vm0, %v883_v28, -inf }
 0xbea   :  { %895 = vmax.xlane.f32.xlu1 %v894_v22 }
 0xbf6   :  { %931 = vrot.lane.b32.xlu0 %v846_v9, %s1857_s14 }
 0xc45   :  { %v887_v29 = vpop.xlane.xlu1 %886 }
 0xc46   :  { %v897_v31 = vsub.f32 %v876_v16, %v887_v29 }
 0xc48   :  { %v901_v26 = vmul.f32 1.442695, %v897_v31 }
 0xc4a   :  { %1772 = vpow2.f32 %v901_v26 }
 0xc4d   :  { %v890_v33 = vpop.xlane.xlu1 %889 }
 0xc4e   :  { %v898_v35 = vsub.f32 %v878_v20, %v890_v33 }
 0xc50   :  { %v1773_v36 = vpop.eup %1772  ;;  %v903_v39 = vmul.f32 1.442695, %v898_v35 }
 0xc51   :  { %v909_v30 = vsel %vm60_vm0, %v1773_v36, 0.0 }
 0xc52   :  { %1774 = vpow2.f32 %v903_v39  ;;  %910 = vadd.xlane.f32.xlu2 %v909_v30 }
 0xc55   :  { %v893_v45 = vpop.xlane.xlu0 %892 }
 0xc56   :  { %v899_v46 = vsub.f32 %v881_v24, %v893_v45 }
 0xc58   :  { %v1775_v40 = vpop.eup %1774  ;;  %v905_v47 = vmul.f32 1.442695, %v899_v46 }
 0xc59   :  { %v912_v34 = vsel %vm60_vm0, %v1775_v40, 0.0 }
 0xc5a   :  { %913 = vadd.xlane.f32.xlu1 %v912_v34 }
 0xc5d   :  { %v896_v7 = vpop.xlane.xlu1 %895 }
 0xc5e   :  { %v900_v41 = vsub.f32 %v883_v28, %v896_v7 }
 0xc60   :  { %v907_v11 = vmul.f32 1.442695, %v900_v41 }
 0xc62   :  { %1776 = vpow2.f32 %v907_v11 }
 0xc63   :  { %1778 = vpow2.f32 %v905_v47 }
 0xc68   :  { %v1777_v43 = vpop.eup %1776  ;;  %v932_v58 = vpop.permute.xlu0 %931 }
 0xc69   :  { %v918_v44 = vsel %vm60_vm0, %v1777_v43, 0.0  ;;  %v1779_v49 = vpop.eup %1778 }
 0xc6a   :  { %919 = vadd.xlane.f32.xlu2 %v918_v44  ;;  %v915_v51 = vsel %vm60_vm0, %v1779_v49, 0.0 }
 0xc73   :  { %933 = vrot.lane.b32.xlu1 %v847_v10, %s1857_s14 }
 0xc9d   :  { %916 = vadd.xlane.f32.xlu1 %v915_v51 }
 0xcc5   :  { %v911_v53 = vpop.xlane.xlu2 %910 }
 0xccd   :  { %v914_v52 = vpop.xlane.xlu1 %913 }
 0xcce   :  { %1780 = vrcp.f32 %v914_v52 }
 0xccf   :  { %1782 = vrcp.f32 %v911_v53 }
 0xcd4   :  { %v1781_v54 = vpop.eup %1780 }
 0xcd5   :  { %v1783_v56 = vpop.eup %1782  ;;  %v926_v57 = vmul.f32 %v1781_v54, %v1775_v40 }
 0xcd6   :  { %v925_v59 = vmul.f32 %v1783_v56, %v1773_v36 }
 0xcd8   :  { %v929_v60 = vpack.c.bf16 %v926_v57, %v925_v59 }
 0xcdd   :  { %v920_v3 = vpop.xlane.xlu2 %919 }
 0xcde   :  { %1784 = vrcp.f32 %v920_v3 }
 0xce4   :  { %v1785_v63 = vpop.eup %1784 }
 0xce5   :  { %v934_v55 = vpop.permute.xlu1 %933  ;;  %v928_v1 = vmul.f32 %v1785_v63, %v1777_v43  ;;  %v1647_v63 = vld [vmem:[#allocation2 + $0x108] sm:$0xff] }
 0xce6   :  { %949 = vmatpush.bf16.msrb.mxu3 %v934_v55 }
 0xcea   :  { %950 = vmatpush.bf16.msrb.mxu3 %v932_v58  ;;  %v1649_v58 = vld [vmem:[#allocation2 + $0x118] sm:$0xff] }
 0xceb   :  { %1169 = vmatpush.bf16.msra.mxu1 %v1649_v58 }
 0xced   :  { %1541 = vmatmul.msk.bf16.vlgmr.msrb.gmra.mxu3 %vm60_vm0, %v929_v60  ;;  %v1648_v60 = vld [vmem:[#allocation2 + $0x110] sm:$0xff] }
 0xcef   :  { %1170 = vmatpush.bf16.msra.mxu1 %v1648_v60 }
 0xcf3   :  { %1171 = vmatpush.bf16.msra.mxu1 %v1647_v63 }
 0xcf7   :  { %1172 = vmatpush.bf16.msra.mxu1 %v1646_v8  ;;  %v1656_v8 = vld [vmem:[#allocation2 + $0x150] sm:$0xff] }
 0xd10   :  { %v917_v62 = vpop.xlane.xlu1 %916 }
 0xd11   :  { %1786 = vrcp.f32 %v917_v62 }
 0xd17   :  { %v1787_v2 = vpop.eup %1786 }
 0xd18   :  { %v927_v0 = vmul.f32 %v1787_v2, %v1779_v49 }
 0xd1a   :  { %v930_v4 = vpack.c.bf16 %v928_v1, %v927_v0 }
 0xd1c   :  { %1542 = vmatmul.msk.bf16.gmra.mxu3 %vm60_vm0, %v930_v4 }
 0xd70   :  { %v952_v32 = vpop.f32.mrf.mxu3 }
 0xd78   :  { %v954_v9 = vpop.f32.mrf.mxu3 }
 0xd79   :  { %v966_v10 = vpack.c.bf16 %v954_v9, %v952_v32  ;;  %v1724_v9 = vld [vmem:[%s2175_s0 + $0x38] ss:$0 sm:$0xff] }
 0xd7b   :  { %1551 = vmatmul.msk.bf16.vlgmr.msrb.gmra.mxu0 %vm60_vm0, %v966_v10 }
 0xd9f   :  { %v957_v12 = vpop.f32.mrf.mxu3 }
 0xda7   :  { %v959_v13 = vpop.f32.mrf.mxu3 }
 0xda8   :  { %v967_v14 = vpack.c.bf16 %v959_v13, %v957_v12  ;;  %v1725_v12 = vld [vmem:[%s2175_s0 + $0x39] ss:$0 sm:$0xff] }
 0xdaa   :  { %1552 = vmatmul.msk.bf16.gmra.mxu0 %vm60_vm0, %v967_v14 }
 0xdf8   :  { %v995_v15 = vpop.f32.mrf.mxu0 }
 0xdf9   :  { %v1005_v18 = vadd.f32 %v995_v15, %v2048_v61 }
 0xe00   :  { %v997_v37 = vpop.f32.mrf.mxu0 }
 0xe01   :  { %v1006_v24 = vadd.f32 %v997_v37, %v2053_v5 }
 0xe27   :  { %v1000_v16 = vpop.f32.mrf.mxu0 }
 0xe28   :  { %1009 = vrot.lane.b32.xlu2 %v1000_v16, %s1859_s19 }
 0xe2f   :  { %v1002_v17 = vpop.f32.mrf.mxu0 }
 0xe30   :  { %1011 = vrot.lane.b32.xlu0 %v1002_v17, %s1859_s19 }
 0xe82   :  { %v1010_v20 = vpop.permute.xlu2 %1009 }
 0xe83   :  { %v2098_v21 = vadd.f32 %v1010_v20, %v1005_v18 }
 0xe85   :  { %v1019_v23 = vsel %vm60_vm0, %v2098_v21, 0.0 }
 0xe86   :  { %1020 = vadd.xlane.f32.xlu0 %v1019_v23 }
 0xea2   :  { %v1012_v25 = vpop.permute.xlu0 %1011 }
 0xea3   :  { %v2103_v27 = vadd.f32 %v1012_v25, %v1006_v24 }
 0xea5   :  { %v1022_v28 = vsel %vm60_vm0, %v2103_v27, 0.0 }
 0xea6   :  { %1023 = vadd.xlane.f32.xlu2 %v1022_v28 }
 0xef9   :  { %v1021_v22 = vpop.xlane.xlu0 %1020 }
 0xefa   :  { %v1025_v29 = vmul.f32 %v1021_v22, %v1914_v19 }
 0xefc   :  { %v1027_v61 = vsub.f32 %v2098_v21, %v1025_v29 }
 0xefe   :  { %v1029_v31 = vmul.f32 %v1027_v61, %v1027_v61 }
 0xf00   :  { %v1031_v26 = vsel %vm60_vm0, %v1029_v31, 0.0 }
 0xf01   :  { %1032 = vadd.xlane.f32.xlu1 %v1031_v26 }
 0xf19   :  { %v1024_v33 = vpop.xlane.xlu2 %1023 }
 0xf1a   :  { %v1026_v35 = vmul.f32 %v1024_v33, %v1914_v19  ;;  %v1645_v33 = vld [vmem:[#allocation2 + $0xf8] sm:$0xff] }
 0xf1b   :  { %1173 = vmatpush.bf16.msra.mxu1 %v1645_v33 }
 0xf1c   :  { %v1028_v5 = vsub.f32 %v2103_v27, %v1026_v35  ;;  %v1644_v35 = vld [vmem:[#allocation2 + $0xf0] sm:$0xff] }
 0xf1e   :  { %v1030_v36 = vmul.f32 %v1028_v5, %v1028_v5 }
 0xf1f   :  { %1174 = vmatpush.bf16.msra.mxu1 %v1644_v35 }
 0xf20   :  { %v1034_v39 = vsel %vm60_vm0, %v1030_v36, 0.0 }
 0xf21   :  { %1035 = vadd.xlane.f32.xlu1 %v1034_v39 }
 0xf74   :  { %v1033_v30 = vpop.xlane.xlu1 %1032 }
 0xf75   :  { %v1037_v40 = vmul.f32 0.032258064, %v1033_v30 }
 0xf77   :  { %1788 = vrsqrt.f32 %v1037_v40  ;;  %vm1046_vm7 = vcmp.eq.f32.partialorder %v1037_v40, inf  ;;  %v1049_v51 = vand.u32 2147483648, %v1037_v40  ;;  %vm1048_vm8 = vcmp.eq.f32.partialorder %v1037_v40, 0.0 }
 0xf7d   :  { %v1789_v34 = vpop.eup %1788 }
 0xf7e   :  { %v1040_v7 = vmul.f32 %v1789_v34, %v1037_v40 }
 0xf80   :  { %v1041_v41 = vmul.f32 %v1789_v34, %v1040_v7 }
 0xf82   :  { %v1042_v11 = vmul.f32 0.5, %v1041_v41 }
 0xf84   :  { %v1043_v43 = vsub.f32 1.5, %v1042_v11 }
 0xf86   :  { %v1044_v44 = vmul.f32 %v1789_v34, %v1043_v43 }
 0xf88   :  { %v1045_v47 = vmul.f32 %v1044_v44, %v1037_v40 }
 0xf8a   :  { %v1047_v49 = vsel %vm1046_vm7, %v1037_v40, %v1045_v47  ;;  %v1726_v47 = vld [vmem:[%s2175_s0 + $0x3a] ss:$0 sm:$0xff] }
 0xf8b   :  { %v1050_v54 = vsel %vm1048_vm8, %v1049_v51, %v1047_v49 }
 0xf8c   :  { %v1063_v56 = vadd.f32 1e-06, %v1050_v54 }
 0xf94   :  { %v1036_v45 = vpop.xlane.xlu1 %1035 }
 0xf95   :  { %v1038_v46 = vmul.f32 0.032258064, %v1036_v45 }
 0xf97   :  { %1790 = vrsqrt.f32 %v1038_v46  ;;  %vm1058_vm9 = vcmp.eq.f32.partialorder %v1038_v46, inf  ;;  %v1061_v2 = vand.u32 2147483648, %v1038_v46  ;;  %vm1060_vm3 = vcmp.eq.f32.partialorder %v1038_v46, 0.0 }
 0xf98   :  { %1792 = vrcp.f32 %v1063_v56 }
 0xf9d   :  { %v1791_v52 = vpop.eup %1790 }
 0xf9e   :  { %v1052_v53 = vmul.f32 %v1791_v52, %v1038_v46  ;;  %v1793_v1 = vpop.eup %1792 }
 0xf9f   :  { %v1067_v32 = vmul.f32 %v1793_v1, %v1027_v61 }
 0xfa0   :  { %v1053_v55 = vmul.f32 %v1791_v52, %v1052_v53 }
 0xfa1   :  { %v1070_v10 = vmul.f32 %v1724_v9, %v1067_v32  ;;  %v1201_v32 = vld [vmem:[#allocation2 + $0x168] sm:$0x7] }
 0xfa2   :  { %v1054_v57 = vmul.f32 0.5, %v1053_v55 }
 0xfa3   :  { %v1073_v15 = vadd.f32 %v1725_v12, %v1070_v10 }
 0xfa4   :  { %v1055_v59 = vsub.f32 1.5, %v1054_v57 }
 0xfa5   :  { %v1092_v17 = vrot.slane %v1073_v15, 7  ;;  %v1099_v23 = vrot.slane %v1073_v15, 1 }
 0xfa6   :  { %v1056_v3 = vmul.f32 %v1791_v52, %v1055_v59 }
 0xfa8   :  { %v1057_v62 = vmul.f32 %v1056_v3, %v1038_v46 }
 0xfaa   :  { %v1059_v0 = vsel %vm1058_vm9, %v1038_v46, %v1057_v62 }
 0xfab   :  { %v1062_v4 = vsel %vm1060_vm3, %v1061_v2, %v1059_v0 }
 0xfac   :  { %v1064_v6 = vadd.f32 1e-06, %v1062_v4 }
 0xfae   :  { %1794 = vrcp.f32 %v1064_v6  ;;  %v1657_v6 = vld [vmem:[#allocation2 + $0x158] sm:$0xff] }
 0xfaf   :  { %1307 = vmatpush.bf16.msra.mxu2 %v1657_v6 }
 0xfb3   :  { %1308 = vmatpush.bf16.msra.mxu2 %v1656_v8 }
 0xfb4   :  { %v1795_v13 = vpop.eup %1794 }
 0xfb5   :  { %v1068_v14 = vmul.f32 %v1795_v13, %v1028_v5 }
 0xfb7   :  { %v1071_v37 = vmul.f32 %v1724_v9, %v1068_v14  ;;  %v1281_v9 = vunpack.c.l.b16 %v1201_v32  ;;  %v1654_v14 = vld [vmem:[#allocation2 + $0x140] sm:$0xff] }
 0xfb9   :  { %v1074_v16 = vadd.f32 %v1725_v12, %v1071_v37  ;;  %v1291_v10 = vpack.c.b16 %v1281_v9, %v1281_v9  ;;  %v1655_v12 = vld [vmem:[#allocation2 + $0x148] sm:$0xff]  ;;  %v1658_v37 = vld [vmem:[#allocation2 + $0x160] sm:$0xff] }
 0xfba   :  { %1309 = vmatpush.bf16.msra.mxu2 %v1655_v12 }
 0xfbb   :  { %v1696_v18 = vpack.i.bf16 %v1074_v16, %v1073_v15  ;;  %v1089_v20 = vrot.slane %v1074_v16, 7  ;;  %v1100_v24 = vrot.slane %v1074_v16, 1  ;;  %v1305_v13 = vsel %vm688_vm14, %v1291_v10, 0  ;;  %v1651_v15 = vld [vmem:[#allocation2 + $0x128] sm:$0xff]  ;;  %v1650_v16 = vld [vmem:[#allocation2 + $0x120] sm:$0xff] }
 0xfbc   :  { %1327 = vmatpush.bf16.msrb.mxu1 %v1305_v13 }
 0xfbd   :  { %1697 = vrot.lane.b32.xlu1 %v1696_v18, %s1863_s8  ;;  %v1101_v25 = vsel %vm469_vm11, %v1099_v23, %v1100_v24  ;;  %v1105_v28 = vsel %vm469_vm11, %v1100_v24, %v1099_v23  ;;  %v1093_v22 = vsel %vm453_vm10, %v1092_v17, %v1089_v20  ;;  %v1096_v29 = vsel %vm453_vm10, %v1089_v20, %v1092_v17 }
 0xfbe   :  { %v1106_v61 = vmul.f32 %v1101_v25, %v2009_v42  ;;  %v1107_v31 = vmul.f32 %v1105_v28, %v2002_v38  ;;  %v1097_v30 = vmul.f32 %v1096_v29, %v2014_v48  ;;  %v1098_v40 = vmul.f32 %v1093_v22, %v2016_v50  ;;  %1310 = vmatpush.bf16.msra.mxu2 %v1654_v14 }
 0xfc0   :  { %v1701_v26 = vpack.i.bf16 %v1107_v31, %v1106_v61  ;;  %1328 = vmatpush.bf16.msrb.mxu1 %v1658_v37 }
 0xfc2   :  { %1702 = vrot.lane.b32.xlu0 %v1701_v26, %s1857_s14 }
0x102f   :  { %v1698_v5 = vpop.permute.xlu1 %1697 }
0x1030   :  { %v1700_v36 = vunpack.i.h.bf16 %v1698_v5  ;;  %v1699_v39 = vunpack.i.l.bf16 %v1698_v5 }
0x1032   :  { %v1122_v11 = vsel %vm60_vm0, %v1097_v30, %v1699_v39  ;;  %v1123_v43 = vsel %vm60_vm0, %v1098_v40, %v1700_v36 }
0x1034   :  { %v1703_v34 = vpop.permute.xlu0 %1702 }
0x1035   :  { %v1705_v7 = vunpack.i.h.bf16 %v1703_v34  ;;  %v1704_v41 = vunpack.i.l.bf16 %v1703_v34 }
0x1037   :  { %v1124_v44 = vsel %vm503_vm12, %v1122_v11, %v1704_v41  ;;  %v1125_v45 = vsel %vm503_vm12, %v1123_v43, %v1705_v7 }
0x1038   :  { %v1126_v46 = vpack.c.bf16 %v1125_v45, %v1124_v44 }
0x103a   :  { %1577 = vmatmul.msk.bf16.vlgmr.msra.gmra.mxu1 %vm544_vm13, %v1126_v46 }
0x10b7   :  { %v1176_v49 = vpop.f32.mrf.mxu1 }
0x10b8   :  { %v1177_v51 = vadd.f32 %v1726_v47, %v1176_v49 }
0x10ba   :  { %v1181_v52 = vmax.f32 %v1177_v51, 0.0 }
0x10bc   :  { %v1207_v56 = vrot.slane %v1181_v52, 7  ;;  %v1214_v57 = vrot.slane %v1181_v52, 1 }
0x10bf   :  { %v1178_v53 = vpop.f32.mrf.mxu1 }
0x10c0   :  { %v1179_v54 = vadd.f32 %v1726_v47, %v1178_v53 }
0x10c2   :  { %v1182_v55 = vmax.f32 %v1179_v54, 0.0 }
0x10c4   :  { %v1204_v58 = vrot.slane %v1182_v55, 7  ;;  %v1215_v59 = vrot.slane %v1182_v55, 1  ;;  %v1706_v60 = vpack.i.bf16 %v1182_v55, %v1181_v52 }
0x10c6   :  { %v1208_v3 = vsel %vm453_vm10, %v1207_v56, %v1204_v58  ;;  %v1211_v62 = vsel %vm453_vm10, %v1204_v58, %v1207_v56  ;;  %1707 = vrot.lane.b32.xlu2 %v1706_v60, %s1864_s11  ;;  %v1216_v63 = vsel %vm469_vm11, %v1214_v57, %v1215_v59  ;;  %v1220_v2 = vsel %vm469_vm11, %v1215_v59, %v1214_v57 }
0x10c7   :  { %v1221_v0 = vmul.f32 %v1216_v63, %v2009_v42  ;;  %v1222_v1 = vmul.f32 %v1220_v2, %v2002_v38  ;;  %v1653_v42 = vld [vmem:[#allocation2 + $0x138] sm:$0xff]  ;;  %v1652_v38 = vld [vmem:[#allocation2 + $0x130] sm:$0xff]  ;;  %v1212_v23 = vmul.f32 %v1211_v62, %v2014_v48  ;;  %v1213_v24 = vmul.f32 %v1208_v3, %v2016_v50 }
0x10c8   :  { %1311 = vmatpush.bf16.msra.mxu2 %v1653_v42  ;;  %v1727_v48 = vld [vmem:[%s2175_s0 + $0x3b] ss:$0 sm:$0xff] }
0x10c9   :  { %v1711_v4 = vpack.i.bf16 %v1222_v1, %v1221_v0 }
0x10cb   :  { %1712 = vrot.lane.b32.xlu1 %v1711_v4, %s1865_s12 }
0x10cc   :  { %1312 = vmatpush.bf16.msra.mxu2 %v1652_v38 }
0x10d0   :  { %1313 = vmatpush.bf16.msra.mxu2 %v1651_v15 }
0x10d4   :  { %1314 = vmatpush.bf16.msra.mxu2 %v1650_v16 }
0x1120   :  { %v1708_v17 = vpop.permute.xlu2 %1707 }
0x1121   :  { %v1710_v18 = vunpack.i.h.bf16 %v1708_v17  ;;  %v1709_v20 = vunpack.i.l.bf16 %v1708_v17  ;;  %v1728_v17 = vld [vmem:[%s2175_s0 + $0x3c] ss:$0 sm:$0xff] }
0x1123   :  { %v1237_v29 = vsel %vm618_vm1, %v1212_v23, %v1709_v20  ;;  %v1238_v61 = vsel %vm618_vm1, %v1213_v24, %v1710_v18  ;;  %v1729_v24 = vld [vmem:[%s2175_s0 + $0x3d] ss:$0 sm:$0xff]  ;;  %s1867_s0 = smov 128  }
0x113d   :  { %v1713_v25 = vpop.permute.xlu1 %1712 }
0x113e   :  { %v1715_v28 = vunpack.i.h.bf16 %v1713_v25  ;;  %v1714_v22 = vunpack.i.l.bf16 %v1713_v25 }
0x1140   :  { %v1239_v31 = vsel %vm621_vm2, %v1237_v29, %v1714_v22  ;;  %v1240_v26 = vsel %vm621_vm2, %v1238_v61, %v1715_v28  ;;  %v1242_v33 = vpack.c.bf16 %v1715_v28, %v1714_v22 }
0x1141   :  { %v1241_v35 = vpack.c.bf16 %v1240_v26, %v1239_v31 }
0x1142   :  { %1614 = vmatmul.msk.bf16.vlgmr.msrb.gmra.mxu1 %vm684_vm15, %v1242_v33 }
0x1143   :  { %1315 = vmatmul.bf16.vlgmr.msra.gmra.mxu2 %v1241_v35 }
0x11bf   :  { %v1330_v50 = vpop.f32.mrf.mxu1 }
0x11c6   :  { %v1316_v5 = vpop.f32.mrf.mxu2 }
0x11c7   :  { %v1317_v36 = vadd.f32 %v1727_v48, %v1316_v5  ;;  %v1332_v11 = vpop.f32.mrf.mxu1 }
0x11c9   :  { %v1331_v39 = vadd.f32 %v1330_v50, %v1317_v36 }
0x11cb   :  { %v1335_v30 = vmax.f32 %v1331_v39, 0.0 }
0x11cd   :  { %v1337_v40 = vadd.f32 %v1335_v30, %v2098_v21 }
0x11ce   :  { %v1318_v34 = vpop.f32.mrf.mxu2 }
0x11cf   :  { %v1319_v7 = vadd.f32 %v1727_v48, %v1318_v34  ;;  %v1341_v41 = vsel %vm60_vm0, %v1337_v40, 0.0 }
0x11d0   :  { %1342 = vadd.xlane.f32.xlu0 %v1341_v41 }
0x11d1   :  { %v1333_v43 = vadd.f32 %v1332_v11, %v1319_v7 }
0x11d3   :  { %v1336_v44 = vmax.f32 %v1333_v43, 0.0 }
0x11d5   :  { %v1338_v45 = vadd.f32 %v1336_v44, %v2103_v27 }
0x11d7   :  { %v1344_v46 = vsel %vm60_vm0, %v1338_v45, 0.0 }
0x11d8   :  { %1345 = vadd.xlane.f32.xlu1 %v1344_v46 }
0x1243   :  { %v1343_v47 = vpop.xlane.xlu0 %1342 }
0x1244   :  { %v1347_v49 = vmul.f32 %v1343_v47, %v1914_v19 }
0x1246   :  { %v1349_v51 = vsub.f32 %v1337_v40, %v1347_v49 }
0x1248   :  { %v1351_v52 = vmul.f32 %v1349_v51, %v1349_v51 }
0x124a   :  { %v1353_v21 = vsel %vm60_vm0, %v1351_v52, 0.0 }
0x124b   :  { %v1346_v53 = vpop.xlane.xlu1 %1345  ;;  %1354 = vadd.xlane.f32.xlu2 %v1353_v21 }
0x124c   :  { %v1348_v54 = vmul.f32 %v1346_v53, %v1914_v19 }
0x124e   :  { %v1350_v55 = vsub.f32 %v1338_v45, %v1348_v54 }
0x1250   :  { %v1352_v56 = vmul.f32 %v1350_v55, %v1350_v55 }
0x1252   :  { %v1356_v57 = vsel %vm60_vm0, %v1352_v56, 0.0 }
0x1253   :  { %1357 = vadd.xlane.f32.xlu0 %v1356_v57 }
0x12be   :  { %v1355_v27 = vpop.xlane.xlu2 %1354 }
0x12bf   :  { %v1359_v58 = vmul.f32 0.032258064, %v1355_v27 }
0x12c1   :  { %1796 = vrsqrt.f32 %v1359_v58  ;;  %vm1368_vm10 = vcmp.eq.f32.partialorder %v1359_v58, inf  ;;  %v1371_v32 = vand.u32 2147483648, %v1359_v58  ;;  %vm1370_vm11 = vcmp.eq.f32.partialorder %v1359_v58, 0.0 }
0x12c6   :  { %v1358_v59 = vpop.xlane.xlu0 %1357 }
0x12c7   :  { %v1797_v60 = vpop.eup %1796  ;;  %v1360_v3 = vmul.f32 0.032258064, %v1358_v59 }
0x12c8   :  { %v1362_v62 = vmul.f32 %v1797_v60, %v1359_v58 }
0x12c9   :  { %1798 = vrsqrt.f32 %v1360_v3  ;;  %vm1380_vm12 = vcmp.eq.f32.partialorder %v1360_v3, inf  ;;  %v1383_v15 = vand.u32 2147483648, %v1360_v3  ;;  %vm1382_vm13 = vcmp.eq.f32.partialorder %v1360_v3, 0.0 }
0x12ca   :  { %v1363_v63 = vmul.f32 %v1797_v60, %v1362_v62 }
0x12cc   :  { %v1364_v2 = vmul.f32 0.5, %v1363_v63 }
0x12ce   :  { %v1365_v0 = vsub.f32 1.5, %v1364_v2 }
0x12cf   :  { %v1799_v1 = vpop.eup %1798 }
0x12d0   :  { %v1366_v4 = vmul.f32 %v1797_v60, %v1365_v0  ;;  %v1374_v6 = vmul.f32 %v1799_v1, %v1360_v3 }
0x12d2   :  { %v1367_v19 = vmul.f32 %v1366_v4, %v1359_v58  ;;  %v1375_v8 = vmul.f32 %v1799_v1, %v1374_v6 }
0x12d4   :  { %v1369_v9 = vsel %vm1368_vm10, %v1359_v58, %v1367_v19  ;;  %v1376_v10 = vmul.f32 0.5, %v1375_v8 }
0x12d5   :  { %v1372_v12 = vsel %vm1370_vm11, %v1371_v32, %v1369_v9 }
0x12d6   :  { %v1385_v13 = vadd.f32 1e-06, %v1372_v12  ;;  %v1377_v14 = vsub.f32 1.5, %v1376_v10 }
0x12d8   :  { %v1378_v42 = vmul.f32 %v1799_v1, %v1377_v14  ;;  %1800 = vrcp.f32 %v1385_v13 }
0x12da   :  { %v1379_v38 = vmul.f32 %v1378_v42, %v1360_v3 }
0x12dc   :  { %v1381_v37 = vsel %vm1380_vm12, %v1360_v3, %v1379_v38 }
0x12dd   :  { %v1384_v16 = vsel %vm1382_vm13, %v1383_v15, %v1381_v37 }
0x12de   :  { %v1801_v18 = vpop.eup %1800  ;;  %v1386_v20 = vadd.f32 1e-06, %v1384_v16 }
0x12df   :  { %v1389_v23 = vmul.f32 %v1801_v18, %v1349_v51 }
0x12e0   :  { %1802 = vrcp.f32 %v1386_v20 }
0x12e1   :  { %v1392_v25 = vmul.f32 %v1728_v17, %v1389_v23 }
0x12e3   :  { %v1395_v28 = vadd.f32 %v1729_v24, %v1392_v25 }
0x12e5   :  { %1397 = vst.msk [vmem:[#allocation5] sm:$0xff] %vm60_vm0, %v1395_v28 }
0x12e6   :  { %v1803_v22 = vpop.eup %1802 }
0x12e7   :  { %v1390_v29 = vmul.f32 %v1803_v22, %v1350_v55 }
0x12e9   :  { %v1393_v61 = vmul.f32 %v1728_v17, %v1390_v29 }
0x12eb   :  { %v1396_v31 = vadd.f32 %v1729_v24, %v1393_v61 }
0x12ed   :  { %1398 = vst.msk [vmem:[#allocation5 + $0x8] sm:$0xff] %vm60_vm0, %v1396_v31 }
0x12ee   :  { %1411 = dma.vmem_to_hbm [thread:$0]  %s1404_s3, 256, %s1406_s6, [#allocation4], %s1867_s0, %s1867_s0, %s1868_s7  }
0x12ef   :  { %1854 = dma.done.wait [#allocation4], 256  }
0x12f0   :  { %1855 = vsyncadd [#allocation4], 4294967040 }
0x12f1   :  { %1416 = vsyncpa [#allocation3], 1 }
0x12f2   :  { %1417 = vsyncpa [#allocation4], 1 }

</bundles_post_ra>
